<compile_context>
chip_gen: v6e
topology: v6e:2x2x1
jax: 0.10.0
libtpu: 0.0.40
codegen_flags: <defaults>
</compile_context>

<pallas_src>
import math
from functools import partial

import jax
import jax.numpy as jnp
from jax.experimental import pallas as pl
from jax.experimental.pallas import tpu as pltpu

_LANE = 128


# ----------------------------------------------------------------------------
# small helpers
# ----------------------------------------------------------------------------
def _round_up(n, m):
    return (n + m - 1) // m * m


def _lcm(a, b):
    return a * b // math.gcd(a, b)


def _pad2(a, rows, cols):
    return jnp.pad(a, ((0, rows - a.shape[0]), (0, cols - a.shape[1])))


def _vmem_limit_bytes():
    # ~3/4 of physical VMEM, capped at 96 MiB:
    #   v5e/v6e (128 MiB) -> 96 MiB, v7x (64 MiB) -> 48 MiB.
    try:
        cap = pltpu.get_tpu_info().vmem_capacity_bytes
        return int(min(96 * 1024 * 1024, cap * 3 // 4))
    except Exception:
        return 32 * 1024 * 1024


# ----------------------------------------------------------------------------
# Stage 1: node embedding MLP (Linear -> ReLU -> Linear), tiled over node rows.
# VMEM here is cheap, so this stage gets its own (larger) row tile.
# ----------------------------------------------------------------------------
def _node_emb_kernel(x_ref, w0_ref, b0_ref, w1_ref, b1_ref, h_ref):
    h = jnp.dot(x_ref[...], w0_ref[...],
                preferred_element_type=jnp.float32) + b0_ref[...]
    h = jnp.maximum(h, 0.0).astype(jnp.bfloat16)
    h = jnp.dot(h, w1_ref[...],
                preferred_element_type=jnp.float32) + b1_ref[...]
    h_ref[...] = h.astype(jnp.bfloat16)


def _node_emb(x, w0, b0, w1, b1, *, tile_m, vmem_limit):
    n_pad, f_pad = x.shape
    h_pad = w0.shape[1]
    full = lambda a: pl.BlockSpec(a.shape, lambda i: (0, 0))
    return pl.pallas_call(
        _node_emb_kernel,
        out_shape=jax.ShapeDtypeStruct((n_pad, h_pad), jnp.bfloat16),
        grid=(n_pad // tile_m,),
        in_specs=[pl.BlockSpec((tile_m, f_pad), lambda i: (i, 0)),
                  full(w0), full(b0), full(w1), full(b1)],
        out_specs=pl.BlockSpec((tile_m, h_pad), lambda i: (i, 0)),
        compiler_params=pltpu.CompilerParams(
            dimension_semantics=("parallel",),
            vmem_limit_bytes=vmem_limit),
    )(x, w0, b0, w1, b1)


# ----------------------------------------------------------------------------
# Stage 2: one conv block = GraphConv(mean) + post MLP + ReLU.
# Grid = (row tiles [parallel], adjacency-column K tiles [arbitrary, last]).
# agg accumulated in f32 VMEM scratch; h streamed in (tile_k, h_pad) blocks;
# the lin_root operand comes from a second, M-indexed view of h.
# ----------------------------------------------------------------------------
def _conv_block(adj_i8, inv_deg, h, w_conv, b_conv, wpa, bpa, wpb, bpb, *,
                tile_m, tile_k, split_root_matmul, adj_buffers, vmem_limit):
    n_pad = adj_i8.shape[0]
    h_pad = h.shape[1]

    def kernel(adj_ref, invd_ref, h_ref, hroot_ref, wc_ref, bc_ref,
               wa_ref, ba_ref, wb_ref, bb_ref, o_ref, acc_ref):
        k = pl.program_id(1)

        @pl.when(k == 0)
        def _():
            acc_ref[...] = jnp.zeros_like(acc_ref)

        # int8 edge-count tile -> bf16 on the VPU (exact, free under the
        # HBM-bound slack); accumulate the neighbor sum in f32 on the MXU.
        a_tile = adj_ref[...].astype(jnp.bfloat16)
        acc_ref[...] += jnp.dot(a_tile, h_ref[...],
                                preferred_element_type=jnp.float32)

        @pl.when(k == pl.num_programs(1) - 1)
        def _():
            # mean normalization as an f32 per-row scale (no bf16 1/deg).
            agg16 = (acc_ref[...] * invd_ref[...]).astype(jnp.bfloat16)
            h_root = hroot_ref[...]
            if split_root_matmul:
                # v5e: MXU contracts 128 at a time -> two K=H pushes, no concat.
                conv = (jnp.dot(agg16, wc_ref[0:h_pad, :],
                                preferred_element_type=jnp.float32)
                        + jnp.dot(h_root, wc_ref[h_pad:2 * h_pad, :],
                                  preferred_element_type=jnp.float32)
                        + bc_ref[...])
            else:
                # v6e/v7x: single fused [agg|h] @ [W_rel; W_root] K=2H push.
                cat = jnp.concatenate([agg16, h_root], axis=-1)
                conv = jnp.dot(cat, wc_ref[...],
                               preferred_element_type=jnp.float32) + bc_ref[...]
            # post MLP: Linear -> ReLU -> Linear, then the block activation.
            u = jnp.maximum(
                jnp.dot(conv.astype(jnp.bfloat16), wa_ref[...],
                        preferred_element_type=jnp.float32) + ba_ref[...], 0.0)
            v = jnp.dot(u.astype(jnp.bfloat16), wb_ref[...],
                        preferred_element_type=jnp.float32) + bb_ref[...]
            o_ref[...] = jnp.maximum(v, 0.0).astype(jnp.bfloat16)

    adj_kwargs = {}
    if adj_buffers != 2:            # deeper pipelining of the dominant stream
        adj_kwargs["pipeline_mode"] = pl.Buffered(adj_buffers)

    full = lambda a: pl.BlockSpec(a.shape, lambda i, k: (0, 0))
    return pl.pallas_call(
        kernel,
        out_shape=jax.ShapeDtypeStruct((n_pad, h_pad), jnp.bfloat16),
        grid=(n_pad // tile_m, n_pad // tile_k),
        in_specs=[
            pl.BlockSpec((tile_m, tile_k), lambda i, k: (i, k), **adj_kwargs),
            pl.BlockSpec((tile_m, 1), lambda i, k: (i, 0)),      # inv_deg
            pl.BlockSpec((tile_k, h_pad), lambda i, k: (k, 0)),  # h (K stream)
            pl.BlockSpec((tile_m, h_pad), lambda i, k: (i, 0)),  # h (root rows)
            full(w_conv), full(b_conv),
            full(wpa), full(bpa), full(wpb), full(bpb),
        ],
        out_specs=pl.BlockSpec((tile_m, h_pad), lambda i, k: (i, 0)),
        scratch_shapes=[pltpu.VMEM((tile_m, h_pad), jnp.float32)],
        compiler_params=pltpu.CompilerParams(
            dimension_semantics=("parallel", "arbitrary"),
            vmem_limit_bytes=vmem_limit),
    )(adj_i8, inv_deg, h, h, w_conv, b_conv, wpa, bpa, wpb, bpb)


# ----------------------------------------------------------------------------
# Stage 3: global_mean_pool + classifier, K-tiled over node columns so VMEM
# does not scale with N.  Binary int8 one-hot + f32 1/count post-scale.
# ----------------------------------------------------------------------------
def _pool_classifier(pool_i8, inv_count, h, wc, bc, *, tile_k, vmem_limit):
    g_pad, n_pad = pool_i8.shape
    h_pad = h.shape[1]
    c_pad = wc.shape[1]

    def kernel(p_ref, invc_ref, h_ref, w_ref, b_ref, o_ref, acc_ref):
        k = pl.program_id(0)

        @pl.when(k == 0)
        def _():
            acc_ref[...] = jnp.zeros_like(acc_ref)

        acc_ref[...] += jnp.dot(p_ref[...].astype(jnp.bfloat16), h_ref[...],
                                preferred_element_type=jnp.float32)

        @pl.when(k == pl.num_programs(0) - 1)
        def _():
            pooled = (acc_ref[...] * invc_ref[...]).astype(jnp.bfloat16)
            o_ref[...] = jnp.dot(pooled, w_ref[...],
                                 preferred_element_type=jnp.float32) + b_ref[...]

    full = lambda a: pl.BlockSpec(a.shape, lambda k: (0, 0))
    return pl.pallas_call(
        kernel,
        out_shape=jax.ShapeDtypeStruct((g_pad, c_pad), jnp.float32),
        grid=(n_pad // tile_k,),
        in_specs=[
            pl.BlockSpec((g_pad, tile_k), lambda k: (0, k)),
            full(inv_count),
            pl.BlockSpec((tile_k, h_pad), lambda k: (k, 0)),
            full(wc), full(bc),
        ],
        out_specs=pl.BlockSpec((g_pad, c_pad), lambda k: (0, 0)),
        scratch_shapes=[pltpu.VMEM((g_pad, h_pad), jnp.float32)],
        compiler_params=pltpu.CompilerParams(
            dimension_semantics=("arbitrary",),
            vmem_limit_bytes=vmem_limit),
    )(pool_i8, inv_count, h, wc, bc)


# ----------------------------------------------------------------------------
# Full forward: pad to lane/tile-dense shapes, run the three stages, slice.
# ----------------------------------------------------------------------------
def homo_gnn_forward(x, adj_counts, inv_deg, pool_onehot, inv_count, params, *,
                     tile_m=256, tile_k=256, tile_m_emb=512,
                     split_root_matmul=False, adj_buffers=2):
    (w0, b0, w1, b1,
     wr1, br1, wo1, wpa1, bpa1, wpb1, bpb1,
     wr2, br2, wo2, wpa2, bpa2, wpb2, bpb2,
     wc, bc) = params

    # int8 adjacency packs 4 rows / sublane -> keep row tiles 32-aligned.
    assert tile_m % 32 == 0 and tile_k % _LANE == 0 and tile_m_emb % 8 == 0

    n, f_in = x.shape
    num_graphs = pool_onehot.shape[0]
    hidden = w0.shape[1]
    num_classes = wc.shape[1]

    f_pad = _round_up(f_in, _LANE)
    h_pad = _round_up(hidden, _LANE)
    c_pad = _round_up(num_classes, _LANE)
    n_pad = _round_up(n, _lcm(_lcm(tile_m, tile_k), _lcm(tile_m_emb, _LANE)))
    g_pad = _round_up(num_graphs, 32)
    vmem_limit = _vmem_limit_bytes()

    def wp(w, r, c):               # zero-padded bf16 weight (MXU operand)
        return _pad2(w, r, c).astype(jnp.bfloat16)

    def bp(b, c):                  # zero-padded f32 bias, shape (1, c)
        return _pad2(b, 1, c)

    x_p = _pad2(x, n_pad, f_pad).astype(jnp.bfloat16)
    adj_p = _pad2(adj_counts, n_pad, n_pad).astype(jnp.int8)
    invdeg_p = _pad2(inv_deg.reshape(n, 1), n_pad, 1).astype(jnp.float32)
    pool_p = _pad2(pool_onehot, g_pad, n_pad).astype(jnp.int8)
    invcnt_p = _pad2(inv_count.reshape(num_graphs, 1), g_pad, 1).astype(jnp.float32)

    # Fused GraphConv weights: stack [lin_rel ; lin_root] along the input axis.
    wconv1 = jnp.concatenate([wp(wr1, h_pad, h_pad), wp(wo1, h_pad, h_pad)], 0)
    wconv2 = jnp.concatenate([wp(wr2, h_pad, h_pad), wp(wo2, h_pad, h_pad)], 0)

    h = _node_emb(x_p, wp(w0, f_pad, h_pad), bp(b0, h_pad),
                  wp(w1, h_pad, h_pad), bp(b1, h_pad),
                  tile_m=tile_m_emb, vmem_limit=vmem_limit)
    h = _conv_block(adj_p, invdeg_p, h, wconv1, bp(br1, h_pad),
                    wp(wpa1, h_pad, h_pad), bp(bpa1, h_pad),
                    wp(wpb1, h_pad, h_pad), bp(bpb1, h_pad),
                    tile_m=tile_m, tile_k=tile_k,
                    split_root_matmul=split_root_matmul,
                    adj_buffers=adj_buffers, vmem_limit=vmem_limit)
    h = _conv_block(adj_p, invdeg_p, h, wconv2, bp(br2, h_pad),
                    wp(wpa2, h_pad, h_pad), bp(bpa2, h_pad),
                    wp(wpb2, h_pad, h_pad), bp(bpb2, h_pad),
                    tile_m=tile_m, tile_k=tile_k,
                    split_root_matmul=split_root_matmul,
                    adj_buffers=adj_buffers, vmem_limit=vmem_limit)
    logits = _pool_classifier(pool_p, invcnt_p, h,
                              wp(wc, h_pad, c_pad), bp(bc, c_pad),
                              tile_k=tile_k, vmem_limit=vmem_limit)
    return logits[:num_graphs, :num_classes]


# ----------------------------------------------------------------------------
# Glue: deterministic parameter init + graph -> dense operator construction.
# ----------------------------------------------------------------------------
def _init_linear(key, fan_in, fan_out, bias=True):
    kw, kb = jax.random.split(key)
    bound = 1.0 / float(fan_in) ** 0.5
    w = jax.random.uniform(kw, (fan_in, fan_out), jnp.float32, -bound, bound)
    if bias:
        b = jax.random.uniform(kb, (1, fan_out), jnp.float32, -bound, bound)
        return w, b
    return (w,)


def init_params(key, in_dim, hidden, num_classes):
    keys = jax.random.split(key, 12)
    params = []
    # node_emb MLP: Linear(in,H), Linear(H,H)
    params += list(_init_linear(keys[0], in_dim, hidden))
    params += list(_init_linear(keys[1], hidden, hidden))
    # conv block 1: GraphConv lin_rel (bias), lin_root (no bias), post MLP
    params += list(_init_linear(keys[2], hidden, hidden))
    params += list(_init_linear(keys[3], hidden, hidden, bias=False))
    params += list(_init_linear(keys[4], hidden, hidden))
    params += list(_init_linear(keys[5], hidden, hidden))
    # conv block 2
    params += list(_init_linear(keys[6], hidden, hidden))
    params += list(_init_linear(keys[7], hidden, hidden, bias=False))
    params += list(_init_linear(keys[8], hidden, hidden))
    params += list(_init_linear(keys[9], hidden, hidden))
    # classifier
    params += list(_init_linear(keys[10], hidden, num_classes))
    return tuple(params)


def build_graph_operators(edge_index, batch, num_nodes, num_graphs):
    src, dst = edge_index[0], edge_index[1]
    # Edge-count adjacency (exact for multi-edges, like GraphConv's scatter
    # sum); the 1/deg mean normalization is factored out as an f32 scale.
    # TODO(synk): edge multiplicities > 127 would overflow the int8 HBM layout;
    #             use int16/int32 counts (or pre-normalized bf16) in that case.
    adj = jnp.zeros((num_nodes, num_nodes), jnp.int32).at[dst, src].add(1)
    deg = adj.sum(axis=1).astype(jnp.float32)
    inv_deg = 1.0 / jnp.maximum(deg, 1.0)
    # per-graph binary one-hot + 1/count scale for global_mean_pool
    onehot = (batch[None, :] == jnp.arange(num_graphs)[:, None]).astype(jnp.int32)
    counts = onehot.sum(axis=1).astype(jnp.float32)
    inv_count = 1.0 / jnp.maximum(counts, 1.0)
    return adj, inv_deg, onehot, inv_count


# ----------------------------------------------------------------------------
# Plain-JAX reference (scatter-based, f32) for correctness checking.
# ----------------------------------------------------------------------------
def reference_forward(x, edge_index, batch, params, num_graphs):
    (w0, b0, w1, b1,
     wr1, br1, wo1, wpa1, bpa1, wpb1, bpb1,
     wr2, br2, wo2, wpa2, bpa2, wpb2, bpb2,
     wc, bc) = params
    src, dst = edge_index[0], edge_index[1]
    n = x.shape[0]

    def mlp(h, wa, ba, wb, bb):
        return jnp.maximum(h @ wa + ba, 0.0) @ wb + bb

    def mean_aggr(h):
        summed = jnp.zeros((n, h.shape[1]), jnp.float32).at[dst].add(h[src])
        deg = jnp.zeros((n,), jnp.float32).at[dst].add(1.0)
        return summed / jnp.maximum(deg, 1.0)[:, None]

    h = mlp(x, w0, b0, w1, b1)
    h = jnp.maximum(mlp(mean_aggr(h) @ wr1 + br1 + h @ wo1,
                        wpa1, bpa1, wpb1, bpb1), 0.0)
    h = jnp.maximum(mlp(mean_aggr(h) @ wr2 + br2 + h @ wo2,
                        wpa2, bpa2, wpb2, bpb2), 0.0)
    summed = jnp.zeros((num_graphs, h.shape[1]), jnp.float32).at[batch].add(h)
    counts = jnp.zeros((num_graphs,), jnp.float32).at[batch].add(1.0)
    pooled = summed / jnp.maximum(counts, 1.0)[:, None]
    return pooled @ wc + bc


if __name__ == "__main__":
    N, F_IN, HIDDEN, NUM_CLASSES, NUM_GRAPHS = 16, 8, 32, 4, 2
    # Small test tiles; at real sizes see the per-generation guidance up top.
    TILE_M, TILE_K, TILE_M_EMB = 64, 128, 128

    key = jax.random.PRNGKey(0)
    kx, ke1, ke2, ke3, ke4, kp = jax.random.split(key, 6)

    # node features
    x = jax.random.normal(kx, (N, F_IN), jnp.float32)

    # two graphs of 8 nodes each; random intra-graph directed edges
    src0 = jax.random.randint(ke1, (20,), 0, 8)
    dst0 = jax.random.randint(ke2, (20,), 0, 8)
    src1 = jax.random.randint(ke3, (20,), 8, 16)
    dst1 = jax.random.randint(ke4, (20,), 8, 16)
    edge_index = jnp.stack([jnp.concatenate([src0, src1]),
                            jnp.concatenate([dst0, dst1])]).astype(jnp.int32)
    batch = jnp.concatenate([jnp.zeros(8, jnp.int32), jnp.ones(8, jnp.int32)])

    params = init_params(kp, F_IN, HIDDEN, NUM_CLASSES)
    adj_counts, inv_deg, pool_onehot, inv_count = build_graph_operators(
        edge_index, batch, N, NUM_GRAPHS)

    fwd = jax.jit(partial(homo_gnn_forward,
                          tile_m=TILE_M, tile_k=TILE_K, tile_m_emb=TILE_M_EMB))
    out = jax.block_until_ready(
        fwd(x, adj_counts, inv_deg, pool_onehot, inv_count, params))

    ref = reference_forward(x, edge_index, batch, params, NUM_GRAPHS)
    assert out.shape == (NUM_GRAPHS, NUM_CLASSES)
    # bf16 MXU operands (f32 accumulation) -> slightly looser tolerance vs f32 ref
    assert jnp.allclose(out, ref, atol=5e-2, rtol=5e-2), (out, ref)

    print("KERNEL_OK")
</pallas_src>

<mosaic_0001>
module attributes {stable_mosaic.version = 11 : i64} {
  func.func @_node_emb_kernel(%arg0: i32, %arg1: memref<128x128xbf16, #tpu.memory_space<vmem>>, %arg2: memref<128x128xbf16, #tpu.memory_space<vmem>>, %arg3: memref<1x128xf32, #tpu.memory_space<vmem>>, %arg4: memref<128x128xbf16, #tpu.memory_space<vmem>>, %arg5: memref<1x128xf32, #tpu.memory_space<vmem>>, %arg6: memref<128x128xbf16, #tpu.memory_space<vmem>>) attributes {dimension_semantics = [#tpu.dimension_semantics<parallel>], iteration_bounds = array<i64: 1>, scalar_prefetch = 0 : i64, scratch_operands = 0 : i64, tpu.core_type = #tpu.core_type<tc>, window_params = [{transform_indices = @transform_0, window_bounds = array<i64: 128, 128>}, {pipeline_mode = #tpu.pipeline_mode<synchronous>, transform_indices = @transform_1, window_bounds = array<i64: 128, 128>}, {pipeline_mode = #tpu.pipeline_mode<synchronous>, transform_indices = @transform_2, window_bounds = array<i64: 1, 128>}, {pipeline_mode = #tpu.pipeline_mode<synchronous>, transform_indices = @transform_3, window_bounds = array<i64: 128, 128>}, {pipeline_mode = #tpu.pipeline_mode<synchronous>, transform_indices = @transform_4, window_bounds = array<i64: 1, 128>}, {transform_indices = @transform_5, window_bounds = array<i64: 128, 128>}]} {
    %c0 = arith.constant 0 : index
    %c0_0 = arith.constant 0 : index
    %0 = vector.load %arg1[%c0, %c0_0] : memref<128x128xbf16, #tpu.memory_space<vmem>>, vector<128x128xbf16>
    %c0_1 = arith.constant 0 : index
    %c0_2 = arith.constant 0 : index
    %1 = vector.load %arg2[%c0_1, %c0_2] : memref<128x128xbf16, #tpu.memory_space<vmem>>, vector<128x128xbf16>
    %cst = arith.constant dense<0.000000e+00> : vector<128x128xf32>
    %2 = tpu.matmul %0, %1, %cst {dimension_numbers = #tpu.dot_dimension_numbers<[1], [0], [0], [1], [0, 0, 1, 1], [], []>} : vector<128x128xbf16>, vector<128x128xbf16>, vector<128x128xf32> -> vector<128x128xf32>
    %c0_3 = arith.constant 0 : index
    %c0_4 = arith.constant 0 : index
    %3 = vector.load %arg3[%c0_3, %c0_4] : memref<1x128xf32, #tpu.memory_space<vmem>>, vector<1x128xf32>
    %4 = vector.broadcast %3 : vector<1x128xf32> to vector<128x128xf32>
    %5 = arith.addf %2, %4 : vector<128x128xf32>
    %cst_5 = arith.constant 0.000000e+00 : f32
    %6 = vector.broadcast %cst_5 : f32 to vector<128x128xf32>
    %7 = arith.maximumf %5, %6 : vector<128x128xf32>
    %8 = arith.truncf %7 : vector<128x128xf32> to vector<128x128xbf16>
    %c0_6 = arith.constant 0 : index
    %c0_7 = arith.constant 0 : index
    %9 = vector.load %arg4[%c0_6, %c0_7] : memref<128x128xbf16, #tpu.memory_space<vmem>>, vector<128x128xbf16>
    %cst_8 = arith.constant dense<0.000000e+00> : vector<128x128xf32>
    %10 = tpu.matmul %8, %9, %cst_8 {dimension_numbers = #tpu.dot_dimension_numbers<[1], [0], [0], [1], [0, 0, 1, 1], [], []>} : vector<128x128xbf16>, vector<128x128xbf16>, vector<128x128xf32> -> vector<128x128xf32>
    %c0_9 = arith.constant 0 : index
    %c0_10 = arith.constant 0 : index
    %11 = vector.load %arg5[%c0_9, %c0_10] : memref<1x128xf32, #tpu.memory_space<vmem>>, vector<1x128xf32>
    %12 = vector.broadcast %11 : vector<1x128xf32> to vector<128x128xf32>
    %13 = arith.addf %10, %12 : vector<128x128xf32>
    %14 = arith.truncf %13 : vector<128x128xf32> to vector<128x128xbf16>
    %c0_11 = arith.constant 0 : index
    %c0_12 = arith.constant 0 : index
    %15 = vector.load %arg6[%c0_11, %c0_12] : memref<128x128xbf16, #tpu.memory_space<vmem>>, vector<128x128xbf16>
    tpu.vector_store %arg6[%c0_11, %c0_12], %14 {strides = array<i32>} : memref<128x128xbf16, #tpu.memory_space<vmem>>, vector<128x128xbf16>,
    return
  }
  func.func @transform_0(%arg0: i32) -> (i32, i32) {
    %c0_i32 = arith.constant 0 : i32
    %c0_i32_0 = arith.constant 0 : i32
    return %arg0, %c0_i32 : i32, i32
  }
  func.func @transform_1(%arg0: i32) -> (i32, i32) {
    %c0_i32 = arith.constant 0 : i32
    %c0_i32_0 = arith.constant 0 : i32
    %c0_i32_1 = arith.constant 0 : i32
    return %c0_i32, %c0_i32_0 : i32, i32
  }
  func.func @transform_2(%arg0: i32) -> (i32, i32) {
    %c0_i32 = arith.constant 0 : i32
    %c0_i32_0 = arith.constant 0 : i32
    %c0_i32_1 = arith.constant 0 : i32
    return %c0_i32, %c0_i32_0 : i32, i32
  }
  func.func @transform_3(%arg0: i32) -> (i32, i32) {
    %c0_i32 = arith.constant 0 : i32
    %c0_i32_0 = arith.constant 0 : i32
    %c0_i32_1 = arith.constant 0 : i32
    return %c0_i32, %c0_i32_0 : i32, i32
  }
  func.func @transform_4(%arg0: i32) -> (i32, i32) {
    %c0_i32 = arith.constant 0 : i32
    %c0_i32_0 = arith.constant 0 : i32
    %c0_i32_1 = arith.constant 0 : i32
    return %c0_i32, %c0_i32_0 : i32, i32
  }
  func.func @transform_5(%arg0: i32) -> (i32, i32) {
    %c0_i32 = arith.constant 0 : i32
    %c0_i32_0 = arith.constant 0 : i32
    return %arg0, %c0_i32 : i32, i32
  }
}

module attributes {stable_mosaic.version = 11 : i64} {
  func.func @kernel(%arg0: i32, %arg1: i32, %arg2: memref<64x128xi8, #tpu.memory_space<vmem>>, %arg3: memref<64x1xf32, #tpu.memory_space<vmem>>, %arg4: memref<128x128xbf16, #tpu.memory_space<vmem>>, %arg5: memref<64x128xbf16, #tpu.memory_space<vmem>>, %arg6: memref<256x128xbf16, #tpu.memory_space<vmem>>, %arg7: memref<1x128xf32, #tpu.memory_space<vmem>>, %arg8: memref<128x128xbf16, #tpu.memory_space<vmem>>, %arg9: memref<1x128xf32, #tpu.memory_space<vmem>>, %arg10: memref<128x128xbf16, #tpu.memory_space<vmem>>, %arg11: memref<1x128xf32, #tpu.memory_space<vmem>>, %arg12: memref<64x128xbf16, #tpu.memory_space<vmem>>, %arg13: memref<64x128xf32, #tpu.memory_space<vmem>>) attributes {dimension_semantics = [#tpu.dimension_semantics<parallel>, #tpu.dimension_semantics<arbitrary>], iteration_bounds = array<i64: 2, 1>, scalar_prefetch = 0 : i64, scratch_operands = 1 : i64, tpu.core_type = #tpu.core_type<tc>, window_params = [{transform_indices = @transform_0, window_bounds = array<i64: 64, 128>}, {transform_indices = @transform_1, window_bounds = array<i64: 64, 1>}, {transform_indices = @transform_2, window_bounds = array<i64: 128, 128>}, {transform_indices = @transform_3, window_bounds = array<i64: 64, 128>}, {pipeline_mode = #tpu.pipeline_mode<synchronous>, transform_indices = @transform_4, window_bounds = array<i64: 256, 128>}, {pipeline_mode = #tpu.pipeline_mode<synchronous>, transform_indices = @transform_5, window_bounds = array<i64: 1, 128>}, {pipeline_mode = #tpu.pipeline_mode<synchronous>, transform_indices = @transform_6, window_bounds = array<i64: 128, 128>}, {pipeline_mode = #tpu.pipeline_mode<synchronous>, transform_indices = @transform_7, window_bounds = array<i64: 1, 128>}, {pipeline_mode = #tpu.pipeline_mode<synchronous>, transform_indices = @transform_8, window_bounds = array<i64: 128, 128>}, {pipeline_mode = #tpu.pipeline_mode<synchronous>, transform_indices = @transform_9, window_bounds = array<i64: 1, 128>}, {transform_indices = @transform_10, window_bounds = array<i64: 64, 128>}]} {
    %c0_i32 = arith.constant 0 : i32
    %0 = arith.cmpi eq, %arg1, %c0_i32 : i32
    %1 = arith.extui %0 : i1 to i32
    %c0_i32_0 = arith.constant 0 : i32
    %2 = arith.cmpi ne, %1, %c0_i32_0 : i32
    scf.if %2 {
      %cst_10 = arith.constant 0.000000e+00 : f32
      %13 = vector.broadcast %cst_10 : f32 to vector<64x128xf32>
      %c0_11 = arith.constant 0 : index
      %c0_12 = arith.constant 0 : index
      %14 = vector.load %arg13[%c0_11, %c0_12] : memref<64x128xf32, #tpu.memory_space<vmem>>, vector<64x128xf32>
      tpu.vector_store %arg13[%c0_11, %c0_12], %13 {strides = array<i32>} : memref<64x128xf32, #tpu.memory_space<vmem>>, vector<64x128xf32>,
    } else {
    }
    %c0 = arith.constant 0 : index
    %c0_1 = arith.constant 0 : index
    %3 = vector.load %arg2[%c0, %c0_1] : memref<64x128xi8, #tpu.memory_space<vmem>>, vector<64x128xi8>
    %4 = arith.sitofp %3 : vector<64x128xi8> to vector<64x128xbf16>
    %c0_2 = arith.constant 0 : index
    %c0_3 = arith.constant 0 : index
    %5 = vector.load %arg13[%c0_2, %c0_3] : memref<64x128xf32, #tpu.memory_space<vmem>>, vector<64x128xf32>
    %c0_4 = arith.constant 0 : index
    %c0_5 = arith.constant 0 : index
    %6 = vector.load %arg4[%c0_4, %c0_5] : memref<128x128xbf16, #tpu.memory_space<vmem>>, vector<128x128xbf16>
    %cst = arith.constant dense<0.000000e+00> : vector<64x128xf32>
    %7 = tpu.matmul %4, %6, %cst {dimension_numbers = #tpu.dot_dimension_numbers<[1], [0], [0], [1], [0, 0, 1, 1], [], []>} : vector<64x128xbf16>, vector<128x128xbf16>, vector<64x128xf32> -> vector<64x128xf32>
    %8 = arith.addf %5, %7 : vector<64x128xf32>
    %c0_6 = arith.constant 0 : index
    %c0_7 = arith.constant 0 : index
    %9 = vector.load %arg13[%c0_6, %c0_7] : memref<64x128xf32, #tpu.memory_space<vmem>>, vector<64x128xf32>
    tpu.vector_store %arg13[%c0_6, %c0_7], %8 {strides = array<i32>} : memref<64x128xf32, #tpu.memory_space<vmem>>, vector<64x128xf32>,
    %c0_i32_8 = arith.constant 0 : i32
    %10 = arith.cmpi eq, %arg1, %c0_i32_8 : i32
    %11 = arith.extui %10 : i1 to i32
    %c0_i32_9 = arith.constant 0 : i32
    %12 = arith.cmpi ne, %11, %c0_i32_9 : i32
    scf.if %12 {
      %c0_10 = arith.constant 0 : index
      %c0_11 = arith.constant 0 : index
      %13 = vector.load %arg13[%c0_10, %c0_11] : memref<64x128xf32, #tpu.memory_space<vmem>>, vector<64x128xf32>
      %c0_12 = arith.constant 0 : index
      %c0_13 = arith.constant 0 : index
      %14 = vector.load %arg3[%c0_12, %c0_13] : memref<64x1xf32, #tpu.memory_space<vmem>>, vector<64x1xf32>
      %15 = vector.broadcast %14 : vector<64x1xf32> to vector<64x128xf32>
      %16 = arith.mulf %13, %15 : vector<64x128xf32>
      %17 = arith.truncf %16 : vector<64x128xf32> to vector<64x128xbf16>
      %c0_14 = arith.constant 0 : index
      %c0_15 = arith.constant 0 : index
      %18 = vector.load %arg5[%c0_14, %c0_15] : memref<64x128xbf16, #tpu.memory_space<vmem>>, vector<64x128xbf16>
      %19 = tpu.concatenate %17, %18 in 1 : vector<64x128xbf16>, vector<64x128xbf16> -> vector<64x256xbf16>
      %c0_16 = arith.constant 0 : index
      %c0_17 = arith.constant 0 : index
      %20 = vector.load %arg6[%c0_16, %c0_17] : memref<256x128xbf16, #tpu.memory_space<vmem>>, vector<256x128xbf16>
      %cst_18 = arith.constant dense<0.000000e+00> : vector<64x128xf32>
      %21 = tpu.matmul %19, %20, %cst_18 {dimension_numbers = #tpu.dot_dimension_numbers<[1], [0], [0], [1], [0, 0, 1, 1], [], []>} : vector<64x256xbf16>, vector<256x128xbf16>, vector<64x128xf32> -> vector<64x128xf32>
      %c0_19 = arith.constant 0 : index
      %c0_20 = arith.constant 0 : index
      %22 = vector.load %arg7[%c0_19, %c0_20] : memref<1x128xf32, #tpu.memory_space<vmem>>, vector<1x128xf32>
      %23 = vector.broadcast %22 : vector<1x128xf32> to vector<64x128xf32>
      %24 = arith.addf %21, %23 : vector<64x128xf32>
      %25 = arith.truncf %24 : vector<64x128xf32> to vector<64x128xbf16>
      %c0_21 = arith.constant 0 : index
      %c0_22 = arith.constant 0 : index
      %26 = vector.load %arg8[%c0_21, %c0_22] : memref<128x128xbf16, #tpu.memory_space<vmem>>, vector<128x128xbf16>
      %cst_23 = arith.constant dense<0.000000e+00> : vector<64x128xf32>
      %27 = tpu.matmul %25, %26, %cst_23 {dimension_numbers = #tpu.dot_dimension_numbers<[1], [0], [0], [1], [0, 0, 1, 1], [], []>} : vector<64x128xbf16>, vector<128x128xbf16>, vector<64x128xf32> -> vector<64x128xf32>
      %c0_24 = arith.constant 0 : index
      %c0_25 = arith.constant 0 : index
      %28 = vector.load %arg9[%c0_24, %c0_25] : memref<1x128xf32, #tpu.memory_space<vmem>>, vector<1x128xf32>
      %29 = vector.broadcast %28 : vector<1x128xf32> to vector<64x128xf32>
      %30 = arith.addf %27, %29 : vector<64x128xf32>
      %cst_26 = arith.constant 0.000000e+00 : f32
      %31 = vector.broadcast %cst_26 : f32 to vector<64x128xf32>
      %32 = arith.maximumf %30, %31 : vector<64x128xf32>
      %33 = arith.truncf %32 : vector<64x128xf32> to vector<64x128xbf16>
      %c0_27 = arith.constant 0 : index
      %c0_28 = arith.constant 0 : index
      %34 = vector.load %arg10[%c0_27, %c0_28] : memref<128x128xbf16, #tpu.memory_space<vmem>>, vector<128x128xbf16>
      %cst_29 = arith.constant dense<0.000000e+00> : vector<64x128xf32>
      %35 = tpu.matmul %33, %34, %cst_29 {dimension_numbers = #tpu.dot_dimension_numbers<[1], [0], [0], [1], [0, 0, 1, 1], [], []>} : vector<64x128xbf16>, vector<128x128xbf16>, vector<64x128xf32> -> vector<64x128xf32>
      %c0_30 = arith.constant 0 : index
      %c0_31 = arith.constant 0 : index
      %36 = vector.load %arg11[%c0_30, %c0_31] : memref<1x128xf32, #tpu.memory_space<vmem>>, vector<1x128xf32>
      %37 = vector.broadcast %36 : vector<1x128xf32> to vector<64x128xf32>
      %38 = arith.addf %35, %37 : vector<64x128xf32>
      %cst_32 = arith.constant 0.000000e+00 : f32
      %39 = vector.broadcast %cst_32 : f32 to vector<64x128xf32>
      %40 = arith.maximumf %38, %39 : vector<64x128xf32>
      %41 = arith.truncf %40 : vector<64x128xf32> to vector<64x128xbf16>
      %c0_33 = arith.constant 0 : index
      %c0_34 = arith.constant 0 : index
      %42 = vector.load %arg12[%c0_33, %c0_34] : memref<64x128xbf16, #tpu.memory_space<vmem>>, vector<64x128xbf16>
      tpu.vector_store %arg12[%c0_33, %c0_34], %41 {strides = array<i32>} : memref<64x128xbf16, #tpu.memory_space<vmem>>, vector<64x128xbf16>,
    } else {
    }
    return
  }
  func.func @transform_0(%arg0: i32, %arg1: i32) -> (i32, i32) {
    %c0_i32 = arith.constant 0 : i32
    return %arg0, %arg1 : i32, i32
  }
  func.func @transform_1(%arg0: i32, %arg1: i32) -> (i32, i32) {
    %c0_i32 = arith.constant 0 : i32
    %c0_i32_0 = arith.constant 0 : i32
    return %arg0, %c0_i32 : i32, i32
  }
  func.func @transform_2(%arg0: i32, %arg1: i32) -> (i32, i32) {
    %c0_i32 = arith.constant 0 : i32
    %c0_i32_0 = arith.constant 0 : i32
    return %arg1, %c0_i32 : i32, i32
  }
  func.func @transform_3(%arg0: i32, %arg1: i32) -> (i32, i32) {
    %c0_i32 = arith.constant 0 : i32
    %c0_i32_0 = arith.constant 0 : i32
    return %arg0, %c0_i32 : i32, i32
  }
  func.func @transform_4(%arg0: i32, %arg1: i32) -> (i32, i32) {
    %c0_i32 = arith.constant 0 : i32
    %c0_i32_0 = arith.constant 0 : i32
    %c0_i32_1 = arith.constant 0 : i32
    return %c0_i32, %c0_i32_0 : i32, i32
  }
  func.func @transform_5(%arg0: i32, %arg1: i32) -> (i32, i32) {
    %c0_i32 = arith.constant 0 : i32
    %c0_i32_0 = arith.constant 0 : i32
    %c0_i32_1 = arith.constant 0 : i32
    return %c0_i32, %c0_i32_0 : i32, i32
  }
  func.func @transform_6(%arg0: i32, %arg1: i32) -> (i32, i32) {
    %c0_i32 = arith.constant 0 : i32
    %c0_i32_0 = arith.constant 0 : i32
    %c0_i32_1 = arith.constant 0 : i32
    return %c0_i32, %c0_i32_0 : i32, i32
  }
  func.func @transform_7(%arg0: i32, %arg1: i32) -> (i32, i32) {
    %c0_i32 = arith.constant 0 : i32
    %c0_i32_0 = arith.constant 0 : i32
    %c0_i32_1 = arith.constant 0 : i32
    return %c0_i32, %c0_i32_0 : i32, i32
  }
  func.func @transform_8(%arg0: i32, %arg1: i32) -> (i32, i32) {
    %c0_i32 = arith.constant 0 : i32
    %c0_i32_0 = arith.constant 0 : i32
    %c0_i32_1 = arith.constant 0 : i32
    return %c0_i32, %c0_i32_0 : i32, i32
  }
  func.func @transform_9(%arg0: i32, %arg1: i32) -> (i32, i32) {
    %c0_i32 = arith.constant 0 : i32
    %c0_i32_0 = arith.constant 0 : i32
    %c0_i32_1 = arith.constant 0 : i32
    return %c0_i32, %c0_i32_0 : i32, i32
  }
  func.func @transform_10(%arg0: i32, %arg1: i32) -> (i32, i32) {
    %c0_i32 = arith.constant 0 : i32
    %c0_i32_0 = arith.constant 0 : i32
    return %arg0, %c0_i32 : i32, i32
  }
}

module attributes {stable_mosaic.version = 11 : i64} {
  func.func @kernel(%arg0: i32, %arg1: memref<32x128xi8, #tpu.memory_space<vmem>>, %arg2: memref<32x1xf32, #tpu.memory_space<vmem>>, %arg3: memref<128x128xbf16, #tpu.memory_space<vmem>>, %arg4: memref<128x128xbf16, #tpu.memory_space<vmem>>, %arg5: memref<1x128xf32, #tpu.memory_space<vmem>>, %arg6: memref<32x128xf32, #tpu.memory_space<vmem>>, %arg7: memref<32x128xf32, #tpu.memory_space<vmem>>) attributes {dimension_semantics = [#tpu.dimension_semantics<arbitrary>], iteration_bounds = array<i64: 1>, scalar_prefetch = 0 : i64, scratch_operands = 1 : i64, tpu.core_type = #tpu.core_type<tc>, window_params = [{transform_indices = @transform_0, window_bounds = array<i64: 32, 128>}, {pipeline_mode = #tpu.pipeline_mode<synchronous>, transform_indices = @transform_1, window_bounds = array<i64: 32, 1>}, {transform_indices = @transform_2, window_bounds = array<i64: 128, 128>}, {pipeline_mode = #tpu.pipeline_mode<synchronous>, transform_indices = @transform_3, window_bounds = array<i64: 128, 128>}, {pipeline_mode = #tpu.pipeline_mode<synchronous>, transform_indices = @transform_4, window_bounds = array<i64: 1, 128>}, {pipeline_mode = #tpu.pipeline_mode<synchronous>, transform_indices = @transform_5, window_bounds = array<i64: 32, 128>}]} {
    %c0_i32 = arith.constant 0 : i32
    %0 = arith.cmpi eq, %arg0, %c0_i32 : i32
    %1 = arith.extui %0 : i1 to i32
    %c0_i32_0 = arith.constant 0 : i32
    %2 = arith.cmpi ne, %1, %c0_i32_0 : i32
    scf.if %2 {
      %cst_10 = arith.constant 0.000000e+00 : f32
      %13 = vector.broadcast %cst_10 : f32 to vector<32x128xf32>
      %c0_11 = arith.constant 0 : index
      %c0_12 = arith.constant 0 : index
      %14 = vector.load %arg7[%c0_11, %c0_12] : memref<32x128xf32, #tpu.memory_space<vmem>>, vector<32x128xf32>
      tpu.vector_store %arg7[%c0_11, %c0_12], %13 {strides = array<i32>} : memref<32x128xf32, #tpu.memory_space<vmem>>, vector<32x128xf32>,
    } else {
    }
    %c0 = arith.constant 0 : index
    %c0_1 = arith.constant 0 : index
    %3 = vector.load %arg7[%c0, %c0_1] : memref<32x128xf32, #tpu.memory_space<vmem>>, vector<32x128xf32>
    %c0_2 = arith.constant 0 : index
    %c0_3 = arith.constant 0 : index
    %4 = vector.load %arg1[%c0_2, %c0_3] : memref<32x128xi8, #tpu.memory_space<vmem>>, vector<32x128xi8>
    %5 = arith.sitofp %4 : vector<32x128xi8> to vector<32x128xbf16>
    %c0_4 = arith.constant 0 : index
    %c0_5 = arith.constant 0 : index
    %6 = vector.load %arg3[%c0_4, %c0_5] : memref<128x128xbf16, #tpu.memory_space<vmem>>, vector<128x128xbf16>
    %cst = arith.constant dense<0.000000e+00> : vector<32x128xf32>
    %7 = tpu.matmul %5, %6, %cst {dimension_numbers = #tpu.dot_dimension_numbers<[1], [0], [0], [1], [0, 0, 1, 1], [], []>} : vector<32x128xbf16>, vector<128x128xbf16>, vector<32x128xf32> -> vector<32x128xf32>
    %8 = arith.addf %3, %7 : vector<32x128xf32>
    %c0_6 = arith.constant 0 : index
    %c0_7 = arith.constant 0 : index
    %9 = vector.load %arg7[%c0_6, %c0_7] : memref<32x128xf32, #tpu.memory_space<vmem>>, vector<32x128xf32>
    tpu.vector_store %arg7[%c0_6, %c0_7], %8 {strides = array<i32>} : memref<32x128xf32, #tpu.memory_space<vmem>>, vector<32x128xf32>,
    %c0_i32_8 = arith.constant 0 : i32
    %10 = arith.cmpi eq, %arg0, %c0_i32_8 : i32
    %11 = arith.extui %10 : i1 to i32
    %c0_i32_9 = arith.constant 0 : i32
    %12 = arith.cmpi ne, %11, %c0_i32_9 : i32
    scf.if %12 {
      %c0_10 = arith.constant 0 : index
      %c0_11 = arith.constant 0 : index
      %13 = vector.load %arg7[%c0_10, %c0_11] : memref<32x128xf32, #tpu.memory_space<vmem>>, vector<32x128xf32>
      %c0_12 = arith.constant 0 : index
      %c0_13 = arith.constant 0 : index
      %14 = vector.load %arg2[%c0_12, %c0_13] : memref<32x1xf32, #tpu.memory_space<vmem>>, vector<32x1xf32>
      %15 = vector.broadcast %14 : vector<32x1xf32> to vector<32x128xf32>
      %16 = arith.mulf %13, %15 : vector<32x128xf32>
      %17 = arith.truncf %16 : vector<32x128xf32> to vector<32x128xbf16>
      %c0_14 = arith.constant 0 : index
      %c0_15 = arith.constant 0 : index
      %18 = vector.load %arg4[%c0_14, %c0_15] : memref<128x128xbf16, #tpu.memory_space<vmem>>, vector<128x128xbf16>
      %cst_16 = arith.constant dense<0.000000e+00> : vector<32x128xf32>
      %19 = tpu.matmul %17, %18, %cst_16 {dimension_numbers = #tpu.dot_dimension_numbers<[1], [0], [0], [1], [0, 0, 1, 1], [], []>} : vector<32x128xbf16>, vector<128x128xbf16>, vector<32x128xf32> -> vector<32x128xf32>
      %c0_17 = arith.constant 0 : index
      %c0_18 = arith.constant 0 : index
      %20 = vector.load %arg5[%c0_17, %c0_18] : memref<1x128xf32, #tpu.memory_space<vmem>>, vector<1x128xf32>
      %21 = vector.broadcast %20 : vector<1x128xf32> to vector<32x128xf32>
      %22 = arith.addf %19, %21 : vector<32x128xf32>
      %c0_19 = arith.constant 0 : index
      %c0_20 = arith.constant 0 : index
      %23 = vector.load %arg6[%c0_19, %c0_20] : memref<32x128xf32, #tpu.memory_space<vmem>>, vector<32x128xf32>
      tpu.vector_store %arg6[%c0_19, %c0_20], %22 {strides = array<i32>} : memref<32x128xf32, #tpu.memory_space<vmem>>, vector<32x128xf32>,
    } else {
    }
    return
  }
  func.func @transform_0(%arg0: i32) -> (i32, i32) {
    %c0_i32 = arith.constant 0 : i32
    %c0_i32_0 = arith.constant 0 : i32
    return %c0_i32, %arg0 : i32, i32
  }
  func.func @transform_1(%arg0: i32) -> (i32, i32) {
    %c0_i32 = arith.constant 0 : i32
    %c0_i32_0 = arith.constant 0 : i32
    %c0_i32_1 = arith.constant 0 : i32
    return %c0_i32, %c0_i32_0 : i32, i32
  }
  func.func @transform_2(%arg0: i32) -> (i32, i32) {
    %c0_i32 = arith.constant 0 : i32
    %c0_i32_0 = arith.constant 0 : i32
    return %arg0, %c0_i32 : i32, i32
  }
  func.func @transform_3(%arg0: i32) -> (i32, i32) {
    %c0_i32 = arith.constant 0 : i32
    %c0_i32_0 = arith.constant 0 : i32
    %c0_i32_1 = arith.constant 0 : i32
    return %c0_i32, %c0_i32_0 : i32, i32
  }
  func.func @transform_4(%arg0: i32) -> (i32, i32) {
    %c0_i32 = arith.constant 0 : i32
    %c0_i32_0 = arith.constant 0 : i32
    %c0_i32_1 = arith.constant 0 : i32
    return %c0_i32, %c0_i32_0 : i32, i32
  }
  func.func @transform_5(%arg0: i32) -> (i32, i32) {
    %c0_i32 = arith.constant 0 : i32
    %c0_i32_0 = arith.constant 0 : i32
    %c0_i32_1 = arith.constant 0 : i32
    return %c0_i32, %c0_i32_0 : i32, i32
  }
}

</mosaic_0001>

<bundles_post_ra>
// kernel: homo_gnn_forward.7
= control target key start
LH: loop header
LB: loop body
LE: loop exit
PB: predicated region body
PF: predicated region fallthrough
CT: control target
= control target key end

     0   :  { %v418_v1 = vmov 0   ;;  %s527_s2 = inlined_call_operand.vmem [shape: bf16[128,128], index: 2, kind: input, shape index: {}]   ;;  %s528_s0 = inlined_call_operand.vmem [shape: s8[32,128], index: 0, kind: input, shape index: {}]   ;;  %s529_s1 = inlined_call_operand.vmem [shape: f32[32,1], index: 1, kind: input, shape index: {}]   ;;  %s530_s3 = inlined_call_operand.vmem [shape: bf16[128,128], index: 3, kind: input, shape index: {}]   ;;  %s531_s4 = inlined_call_operand.vmem [shape: f32[1,128], index: 4, kind: input, shape index: {}]   ;;  %s532_s5 = inlined_call_operand.vmem [shape: f32[32,128], index: 5, kind: output, shape index: {}]  }
   0x1   :  { %v402_v0 = vld [vmem:[%s527_s2 + $0x38] sm:$0xff]   ;;  %400 = vset.pattern.permute.xlu0 %v418_v1  ;;  %401 = vset.pattern.permute.xlu1 %v418_v1  ;;  %v403_v2 = vld [vmem:[%s527_s2 + $0x30] sm:$0xff]   ;;  %v404_v3 = vld [vmem:[%s527_s2 + $0x28] sm:$0xff]  }
   0x2   :  { %359 = vmatprep.subr.bf16.mxu0 %v402_v0  ;;  %v405_v4 = vld [vmem:[%s527_s2 + $0x20] sm:$0xff]   ;;  %v166_v7 = vld [vmem:[%s529_s1 + $0x10] sm:$0xff]  ;;  %v165_v9 = vld [vmem:[%s529_s1 + $0x8] sm:$0xff] }
   0x3   :  { %360 = vmatpush3.bf16.msra.mxu0 %v402_v0  ;;  %v33_v5 = vld [vmem:[%s528_s0] sm:$0xff]  ;;  %180 = vperm.xlu1 %401, %v166_v7   ;;  %v167_v10 = vld [vmem:[%s529_s1 + $0x18] sm:$0xff]  ;;  %v411_v12 = vld [vmem:[%s530_s3 + $0x30] sm:$0xff]  }
   0x4   :  { %361 = vmatprep.subr.bf16.mxu0 %v403_v2  ;;  %v164_v6 = vld [vmem:[%s529_s1] sm:$0xff]  ;;  %v34_v8 = vunpack.c.l.s8.bf16 %v33_v5  ;;  %v410_v11 = vld [vmem:[%s530_s3 + $0x38] sm:$0xff]   ;;  %v412_v14 = vld [vmem:[%s530_s3 + $0x28] sm:$0xff]   ;;  %v35_v20 = vunpack.c.h.s8.bf16 %v33_v5 }
   0x5   :  { %170 = vperm.xlu0 %400, %v164_v6   ;;  %v406_v13 = vld [vmem:[%s527_s2 + $0x18] sm:$0xff]   ;;  %379 = vmatprep.subr.bf16.mxu1 %v410_v11  ;;  %v407_v15 = vld [vmem:[%s527_s2 + $0x10] sm:$0xff]   ;;  %v413_v16 = vld [vmem:[%s530_s3 + $0x20] sm:$0xff]  }
   0x6   :  { %375 = vmatprep.mubr.bf16.mxu0 %v34_v8  ;;  %380 = vmatpush3.bf16.msra.mxu1 %v410_v11  ;;  %v408_v17 = vld [vmem:[%s527_s2 + $0x8] sm:$0xff]   ;;  %v414_v18 = vld [vmem:[%s530_s3 + $0x18] sm:$0xff]   ;;  %v409_v19 = vld [vmem:[%s527_s2] sm:$0xff]  }
   0x7   :  { %362 = vmatpush3.bf16.msra.mxu0 %v403_v2  ;;  %185 = vperm.xlu1 %401, %v167_v10   ;;  %v415_v21 = vld [vmem:[%s530_s3 + $0x10] sm:$0xff]   ;;  %v416_v22 = vld [vmem:[%s530_s3 + $0x8] sm:$0xff]   ;;  %v417_v23 = vld [vmem:[%s530_s3] sm:$0xff]  }
   0x8   :  { %363 = vmatprep.subr.bf16.mxu0 %v404_v3  ;;  %381 = vmatprep.subr.bf16.mxu1 %v411_v12  ;;  %v330_v38 = vld [vmem:[%s531_s4] ss:$0 sm:$0xff] }
   0x9   :  { %175 = vperm.xlu0 %400, %v165_v9  }
   0xa   :  { %382 = vmatpush3.bf16.msra.mxu1 %v411_v12 }
   0xb   :  { %364 = vmatpush3.bf16.msra.mxu0 %v404_v3  ;;  %383 = vmatprep.subr.bf16.mxu1 %v412_v14 }
   0xc   :  { %365 = vmatprep.subr.bf16.mxu0 %v405_v4 }
   0xe   :  { %384 = vmatpush3.bf16.msra.mxu1 %v412_v14 }
   0xf   :  { %366 = vmatpush3.bf16.msra.mxu0 %v405_v4  ;;  %385 = vmatprep.subr.bf16.mxu1 %v413_v16 }
  0x10   :  { %367 = vmatprep.subr.bf16.mxu0 %v406_v13 }
  0x12   :  { %386 = vmatpush3.bf16.msra.mxu1 %v413_v16 }
  0x13   :  { %368 = vmatpush3.bf16.msra.mxu0 %v406_v13  ;;  %387 = vmatprep.subr.bf16.mxu1 %v414_v18 }
  0x14   :  { %369 = vmatprep.subr.bf16.mxu0 %v407_v15 }
  0x16   :  { %388 = vmatpush3.bf16.msra.mxu1 %v414_v18 }
  0x17   :  { %370 = vmatpush3.bf16.msra.mxu0 %v407_v15  ;;  %389 = vmatprep.subr.bf16.mxu1 %v415_v21 }
  0x18   :  { %371 = vmatprep.subr.bf16.mxu0 %v408_v17 }
  0x1a   :  { %390 = vmatpush3.bf16.msra.mxu1 %v415_v21 }
  0x1b   :  { %372 = vmatpush3.bf16.msra.mxu0 %v408_v17  ;;  %391 = vmatprep.subr.bf16.mxu1 %v416_v22 }
  0x1c   :  { %373 = vmatprep.subr.bf16.mxu0 %v409_v19 }
  0x1e   :  { %392 = vmatpush3.bf16.msra.mxu1 %v416_v22 }
  0x1f   :  { %374 = vmatpush3.bf16.msra.mxu0 %v409_v19  ;;  %393 = vmatprep.subr.bf16.mxu1 %v417_v23 }
  0x22   :  { %376 = vmatmul.mubr.bf16.vlgmr.msra.gmra.mxu0 %v35_v20  ;;  %394 = vmatpush3.bf16.msra.mxu1 %v417_v23 }
  0x7e   :  { %v181_v24 = vpop.permute.xlu1 %180 }
  0x80   :  { %v171_v25 = vpop.permute.xlu0 %170 }
  0x82   :  { %v186_v28 = vpop.permute.xlu1 %185 }
  0x84   :  { %v176_v30 = vpop.permute.xlu0 %175 }
  0xe2   :  { %v377_v26 = vpop.f32.mrf.mxu0 }
  0xe3   :  { %v190_v35 = vmul.f32 %v377_v26, %v181_v24 }
  0xe4   :  { %v134_v27 = vpop.f32.mrf.mxu0 }
  0xe5   :  { %v188_v33 = vmul.f32 %v171_v25, %v134_v27 }
  0xe6   :  { %v378_v29 = vpop.f32.mrf.mxu0 }
  0xe7   :  { %v191_v31 = vmul.f32 %v378_v29, %v186_v28 }
  0xe8   :  { %v137_v32 = vpop.f32.mrf.mxu0 }
  0xe9   :  { %v189_v34 = vmul.f32 %v176_v30, %v137_v32  ;;  %v193_v37 = vpack.c.bf16 %v191_v31, %v190_v35 }
  0xeb   :  { %v192_v36 = vpack.c.bf16 %v189_v34, %v188_v33 }
  0xed   :  { %395 = vmatprep.mubr.bf16.mxu1 %v192_v36 }
  0xee   :  { %396 = vmatmul.mubr.bf16.vlgmr.msra.gmra.mxu1 %v193_v37 }
 0x1ae   :  { %v397_v39 = vpop.f32.mrf.mxu1 }
 0x1af   :  { %v308_v40 = vadd.f32 %v397_v39, %v330_v38 }
 0x1b0   :  { %v299_v41 = vpop.f32.mrf.mxu1 }
 0x1b1   :  { %316 = vst [vmem:[%s532_s5 + $0x10] sm:$0xff] %v308_v40  ;;  %v300_v42 = vadd.f32 %v330_v38, %v299_v41 }
 0x1b2   :  { %v398_v43 = vpop.f32.mrf.mxu1 }
 0x1b3   :  { %314 = vst [vmem:[%s532_s5] sm:$0xff] %v300_v42  ;;  %v311_v44 = vadd.f32 %v398_v43, %v330_v38 }
 0x1b4   :  { %v302_v45 = vpop.f32.mrf.mxu1 }
 0x1b5   :  { %317 = vst [vmem:[%s532_s5 + $0x18] sm:$0xff] %v311_v44  ;;  %v303_v46 = vadd.f32 %v330_v38, %v302_v45 }
 0x1b7   :  { %315 = vst [vmem:[%s532_s5 + $0x8] sm:$0xff] %v303_v46 }

// kernel: homo_gnn_forward.4
= control target key start
LH: loop header
LB: loop body
LE: loop exit
PB: predicated region body
PF: predicated region fallthrough
CT: control target
= control target key end

     0   :  { %s886_s1 = inlined_call_operand.vmem [shape: bf16[128,128], index: 1, kind: input, shape index: {}]   ;;  %s887_s0 = inlined_call_operand.vmem [shape: bf16[128,128], index: 0, kind: input, shape index: {}]   ;;  %s888_s3 = inlined_call_operand.vmem [shape: bf16[128,128], index: 3, kind: input, shape index: {}]   ;;  %s889_s2 = inlined_call_operand.vmem [shape: f32[1,128], index: 2, kind: input, shape index: {}]   ;;  %s890_s4 = inlined_call_operand.vmem [shape: f32[1,128], index: 4, kind: input, shape index: {}]   ;;  %s891_s5 = inlined_call_operand.vmem [shape: bf16[128,128], index: 5, kind: output, shape index: {}]  }
   0x1   :  { %v730_v0 = vld [vmem:[%s886_s1 + $0x38] sm:$0xff]   ;;  %v731_v1 = vld [vmem:[%s886_s1 + $0x30] sm:$0xff]   ;;  %v732_v2 = vld [vmem:[%s886_s1 + $0x28] sm:$0xff]  }
   0x2   :  { %666 = vmatprep.subr.bf16.mxu0 %v730_v0  ;;  %v733_v3 = vld [vmem:[%s886_s1 + $0x20] sm:$0xff]   ;;  %v734_v5 = vld [vmem:[%s886_s1 + $0x18] sm:$0xff]   ;;  %v735_v6 = vld [vmem:[%s886_s1 + $0x10] sm:$0xff]  }
   0x3   :  { %667 = vmatpush3.bf16.msra.mxu0 %v730_v0  ;;  %v738_v4 = vld [vmem:[%s887_s0] sm:$0xff]   ;;  %v746_v7 = vld [vmem:[%s888_s3 + $0x38] sm:$0xff]   ;;  %v747_v8 = vld [vmem:[%s888_s3 + $0x30] sm:$0xff]  }
   0x4   :  { %668 = vmatprep.subr.bf16.mxu0 %v731_v1  ;;  %682 = vmatprep.mubr.bf16.mxu0 %v738_v4  ;;  %v736_v9 = vld [vmem:[%s886_s1 + $0x8] sm:$0xff]   ;;  %v737_v11 = vld [vmem:[%s886_s1] sm:$0xff]   ;;  %v750_v13 = vld [vmem:[%s888_s3 + $0x18] sm:$0xff]  }
   0x5   :  { %698 = vmatprep.subr.bf16.mxu1 %v746_v7  ;;  %v748_v10 = vld [vmem:[%s888_s3 + $0x28] sm:$0xff]   ;;  %v749_v12 = vld [vmem:[%s888_s3 + $0x20] sm:$0xff]   ;;  %v740_v15 = vld [vmem:[%s887_s0 + $0x10] sm:$0xff]  }
   0x6   :  { %699 = vmatpush3.bf16.msra.mxu1 %v746_v7  ;;  %v739_v14 = vld [vmem:[%s887_s0 + $0x8] sm:$0xff]   ;;  %v741_v16 = vld [vmem:[%s887_s0 + $0x18] sm:$0xff]   ;;  %v742_v17 = vld [vmem:[%s887_s0 + $0x20] sm:$0xff]  }
   0x7   :  { %669 = vmatpush3.bf16.msra.mxu0 %v731_v1  ;;  %700 = vmatprep.subr.bf16.mxu1 %v747_v8  ;;  %v743_v18 = vld [vmem:[%s887_s0 + $0x28] sm:$0xff]   ;;  %v744_v19 = vld [vmem:[%s887_s0 + $0x30] sm:$0xff]   ;;  %v745_v20 = vld [vmem:[%s887_s0 + $0x38] sm:$0xff]  }
   0x8   :  { %670 = vmatprep.subr.bf16.mxu0 %v732_v2  ;;  %v751_v21 = vld [vmem:[%s888_s3 + $0x10] sm:$0xff]   ;;  %v752_v22 = vld [vmem:[%s888_s3 + $0x8] sm:$0xff]   ;;  %v753_v23 = vld [vmem:[%s888_s3] sm:$0xff]  }
   0x9   :  { %v529_v26 = vld [vmem:[%s889_s2] ss:$0 sm:$0xff] }
   0xa   :  { %701 = vmatpush3.bf16.msra.mxu1 %v747_v8 }
   0xb   :  { %671 = vmatpush3.bf16.msra.mxu0 %v732_v2  ;;  %702 = vmatprep.subr.bf16.mxu1 %v748_v10 }
   0xc   :  { %672 = vmatprep.subr.bf16.mxu0 %v733_v3 }
   0xe   :  { %703 = vmatpush3.bf16.msra.mxu1 %v748_v10 }
   0xf   :  { %673 = vmatpush3.bf16.msra.mxu0 %v733_v3  ;;  %704 = vmatprep.subr.bf16.mxu1 %v749_v12 }
  0x10   :  { %674 = vmatprep.subr.bf16.mxu0 %v734_v5 }
  0x12   :  { %705 = vmatpush3.bf16.msra.mxu1 %v749_v12 }
  0x13   :  { %675 = vmatpush3.bf16.msra.mxu0 %v734_v5  ;;  %706 = vmatprep.subr.bf16.mxu1 %v750_v13 }
  0x14   :  { %676 = vmatprep.subr.bf16.mxu0 %v735_v6 }
  0x16   :  { %707 = vmatpush3.bf16.msra.mxu1 %v750_v13 }
  0x17   :  { %677 = vmatpush3.bf16.msra.mxu0 %v735_v6  ;;  %708 = vmatprep.subr.bf16.mxu1 %v751_v21 }
  0x18   :  { %678 = vmatprep.subr.bf16.mxu0 %v736_v9 }
  0x1a   :  { %709 = vmatpush3.bf16.msra.mxu1 %v751_v21 }
  0x1b   :  { %679 = vmatpush3.bf16.msra.mxu0 %v736_v9  ;;  %710 = vmatprep.subr.bf16.mxu1 %v752_v22 }
  0x1c   :  { %680 = vmatprep.subr.bf16.mxu0 %v737_v11 }
  0x1e   :  { %711 = vmatpush3.bf16.msra.mxu1 %v752_v22 }
  0x1f   :  { %681 = vmatpush3.bf16.msra.mxu0 %v737_v11  ;;  %712 = vmatprep.subr.bf16.mxu1 %v753_v23 }
  0x22   :  { %683 = vmatmul.mubr.bf16.vlgmr.msra.gmra.mxu0 %v739_v14  ;;  %713 = vmatpush3.bf16.msra.mxu1 %v753_v23 }
  0x23   :  { %686 = vmatprep.mubr.bf16.mxu0 %v740_v15 }
  0x2a   :  { %687 = vmatmul.mubr.bf16.gmra.mxu0 %v741_v16 }
  0x2b   :  { %690 = vmatprep.mubr.bf16.mxu0 %v742_v17 }
  0x32   :  { %691 = vmatmul.mubr.bf16.gmra.mxu0 %v743_v18  ;;  %v546_v18 = vld [vmem:[%s890_s4] ss:$0 sm:$0xff] }
  0x33   :  { %694 = vmatprep.mubr.bf16.mxu0 %v744_v19 }
  0x3a   :  { %695 = vmatmul.mubr.bf16.gmra.mxu0 %v745_v20 }
  0xe2   :  { %v684_v24 = vpop.f32.mrf.mxu0 }
  0xe3   :  { %v199_v30 = vadd.f32 %v684_v24, %v529_v26 }
  0xe4   :  { %v190_v25 = vpop.f32.mrf.mxu0 }
  0xe5   :  { %v191_v28 = vadd.f32 %v529_v26, %v190_v25  ;;  %v255_v37 = vmax.f32 %v199_v30, 0.0 }
  0xe6   :  { %v685_v27 = vpop.f32.mrf.mxu0 }
  0xe7   :  { %v202_v29 = vadd.f32 %v685_v27, %v529_v26  ;;  %v253_v35 = vmax.f32 %v191_v28, 0.0 }
  0xe8   :  { %v193_v31 = vpop.f32.mrf.mxu0 }
  0xe9   :  { %v194_v32 = vadd.f32 %v529_v26, %v193_v31  ;;  %v256_v33 = vmax.f32 %v202_v29, 0.0 }
  0xea   :  { %v688_v34 = vpop.f32.mrf.mxu0 }
  0xeb   :  { %v254_v36 = vmax.f32 %v194_v32, 0.0  ;;  %v270_v40 = vpack.c.bf16 %v256_v33, %v255_v37  ;;  %v215_v44 = vadd.f32 %v688_v34, %v529_v26 }
  0xec   :  { %v206_v38 = vpop.f32.mrf.mxu0 }
  0xed   :  { %v269_v39 = vpack.c.bf16 %v254_v36, %v253_v35  ;;  %v207_v42 = vadd.f32 %v529_v26, %v206_v38  ;;  %v259_v51 = vmax.f32 %v215_v44, 0.0 }
  0xee   :  { %v689_v41 = vpop.f32.mrf.mxu0 }
  0xef   :  { %v218_v43 = vadd.f32 %v689_v41, %v529_v26  ;;  %714 = vmatprep.mubr.bf16.mxu1 %v269_v39  ;;  %v257_v49 = vmax.f32 %v207_v42, 0.0 }
  0xf0   :  { %v209_v45 = vpop.f32.mrf.mxu0  ;;  %715 = vmatmul.mubr.bf16.vlgmr.msra.gmra.mxu1 %v270_v40 }
  0xf1   :  { %v210_v46 = vadd.f32 %v529_v26, %v209_v45  ;;  %v260_v47 = vmax.f32 %v218_v43, 0.0 }
  0xf2   :  { %v692_v48 = vpop.f32.mrf.mxu0 }
  0xf3   :  { %v258_v50 = vmax.f32 %v210_v46, 0.0  ;;  %v272_v54 = vpack.c.bf16 %v260_v47, %v259_v51  ;;  %v231_v58 = vadd.f32 %v692_v48, %v529_v26 }
  0xf4   :  { %v222_v52 = vpop.f32.mrf.mxu0 }
  0xf5   :  { %v271_v53 = vpack.c.bf16 %v258_v50, %v257_v49  ;;  %v223_v56 = vadd.f32 %v529_v26, %v222_v52  ;;  %v263_v1 = vmax.f32 %v231_v58, 0.0 }
  0xf6   :  { %v693_v55 = vpop.f32.mrf.mxu0 }
  0xf7   :  { %v234_v57 = vadd.f32 %v693_v55, %v529_v26  ;;  %718 = vmatprep.mubr.bf16.mxu1 %v271_v53  ;;  %v261_v63 = vmax.f32 %v223_v56, 0.0 }
  0xf8   :  { %v225_v59 = vpop.f32.mrf.mxu0  ;;  %719 = vmatmul.mubr.bf16.gmra.mxu1 %v272_v54 }
  0xf9   :  { %v226_v60 = vadd.f32 %v529_v26, %v225_v59  ;;  %v264_v61 = vmax.f32 %v234_v57, 0.0 }
  0xfa   :  { %v696_v62 = vpop.f32.mrf.mxu0 }
  0xfb   :  { %v262_v0 = vmax.f32 %v226_v60, 0.0  ;;  %v274_v4 = vpack.c.bf16 %v264_v61, %v263_v1  ;;  %v247_v8 = vadd.f32 %v696_v62, %v529_v26 }
  0xfc   :  { %v238_v2 = vpop.f32.mrf.mxu0 }
  0xfd   :  { %v273_v3 = vpack.c.bf16 %v262_v0, %v261_v63  ;;  %v239_v6 = vadd.f32 %v529_v26, %v238_v2  ;;  %v267_v14 = vmax.f32 %v247_v8, 0.0 }
  0xfe   :  { %v697_v5 = vpop.f32.mrf.mxu0 }
  0xff   :  { %v250_v7 = vadd.f32 %v697_v5, %v529_v26  ;;  %722 = vmatprep.mubr.bf16.mxu1 %v273_v3  ;;  %v265_v12 = vmax.f32 %v239_v6, 0.0 }
 0x100   :  { %v241_v9 = vpop.f32.mrf.mxu0  ;;  %723 = vmatmul.mubr.bf16.gmra.mxu1 %v274_v4 }
 0x101   :  { %v242_v10 = vadd.f32 %v529_v26, %v241_v9  ;;  %v268_v11 = vmax.f32 %v250_v7, 0.0 }
 0x103   :  { %v266_v13 = vmax.f32 %v242_v10, 0.0  ;;  %v276_v16 = vpack.c.bf16 %v268_v11, %v267_v14 }
 0x105   :  { %v275_v15 = vpack.c.bf16 %v266_v13, %v265_v12 }
 0x107   :  { %726 = vmatprep.mubr.bf16.mxu1 %v275_v15 }
 0x108   :  { %727 = vmatmul.mubr.bf16.gmra.mxu1 %v276_v16 }
 0x1b0   :  { %v716_v17 = vpop.f32.mrf.mxu1 }
 0x1b1   :  { %v391_v21 = vadd.f32 %v716_v17, %v546_v18 }
 0x1b2   :  { %v382_v19 = vpop.f32.mrf.mxu1 }
 0x1b3   :  { %v383_v24 = vadd.f32 %v546_v18, %v382_v19 }
 0x1b4   :  { %v717_v20 = vpop.f32.mrf.mxu1 }
 0x1b5   :  { %v394_v22 = vadd.f32 %v717_v20, %v546_v18 }
 0x1b6   :  { %v385_v23 = vpop.f32.mrf.mxu1 }
 0x1b7   :  { %v595_v25 = vpack.c.bf16 %v394_v22, %v391_v21  ;;  %v386_v26 = vadd.f32 %v546_v18, %v385_v23 }
 0x1b8   :  { %v720_v27 = vpop.f32.mrf.mxu1 }
 0x1b9   :  { %627 = vst [vmem:[%s891_s5 + $0x8] sm:$0xff] %v595_v25   ;;  %v590_v28 = vpack.c.bf16 %v386_v26, %v383_v24  ;;  %v407_v31 = vadd.f32 %v720_v27, %v546_v18 }
 0x1ba   :  { %v398_v29 = vpop.f32.mrf.mxu1 }
 0x1bb   :  { %591 = vst [vmem:[%s891_s5] sm:$0xff] %v590_v28   ;;  %v399_v34 = vadd.f32 %v546_v18, %v398_v29 }
 0x1bc   :  { %v721_v30 = vpop.f32.mrf.mxu1 }
 0x1bd   :  { %v410_v32 = vadd.f32 %v721_v30, %v546_v18 }
 0x1be   :  { %v401_v33 = vpop.f32.mrf.mxu1 }
 0x1bf   :  { %v605_v35 = vpack.c.bf16 %v410_v32, %v407_v31  ;;  %v402_v36 = vadd.f32 %v546_v18, %v401_v33 }
 0x1c0   :  { %v724_v37 = vpop.f32.mrf.mxu1 }
 0x1c1   :  { %629 = vst [vmem:[%s891_s5 + $0x18] sm:$0xff] %v605_v35   ;;  %v600_v38 = vpack.c.bf16 %v402_v36, %v399_v34  ;;  %v423_v41 = vadd.f32 %v724_v37, %v546_v18 }
 0x1c2   :  { %v414_v39 = vpop.f32.mrf.mxu1 }
 0x1c3   :  { %628 = vst [vmem:[%s891_s5 + $0x10] sm:$0xff] %v600_v38   ;;  %v415_v44 = vadd.f32 %v546_v18, %v414_v39 }
 0x1c4   :  { %v725_v40 = vpop.f32.mrf.mxu1 }
 0x1c5   :  { %v426_v42 = vadd.f32 %v725_v40, %v546_v18 }
 0x1c6   :  { %v417_v43 = vpop.f32.mrf.mxu1 }
 0x1c7   :  { %v615_v45 = vpack.c.bf16 %v426_v42, %v423_v41  ;;  %v418_v46 = vadd.f32 %v546_v18, %v417_v43 }
 0x1c8   :  { %v728_v47 = vpop.f32.mrf.mxu1 }
 0x1c9   :  { %631 = vst [vmem:[%s891_s5 + $0x28] sm:$0xff] %v615_v45   ;;  %v610_v48 = vpack.c.bf16 %v418_v46, %v415_v44  ;;  %v439_v51 = vadd.f32 %v728_v47, %v546_v18 }
 0x1ca   :  { %v430_v49 = vpop.f32.mrf.mxu1 }
 0x1cb   :  { %630 = vst [vmem:[%s891_s5 + $0x20] sm:$0xff] %v610_v48   ;;  %v431_v54 = vadd.f32 %v546_v18, %v430_v49 }
 0x1cc   :  { %v729_v50 = vpop.f32.mrf.mxu1 }
 0x1cd   :  { %v442_v52 = vadd.f32 %v729_v50, %v546_v18 }
 0x1ce   :  { %v433_v53 = vpop.f32.mrf.mxu1 }
 0x1cf   :  { %v625_v55 = vpack.c.bf16 %v442_v52, %v439_v51  ;;  %v434_v56 = vadd.f32 %v546_v18, %v433_v53 }
 0x1d1   :  { %633 = vst [vmem:[%s891_s5 + $0x38] sm:$0xff] %v625_v55   ;;  %v620_v57 = vpack.c.bf16 %v434_v56, %v431_v54 }
 0x1d3   :  { %632 = vst [vmem:[%s891_s5 + $0x30] sm:$0xff] %v620_v57  }

// kernel: homo_gnn_forward.5
= control target key start
LH: loop header
LB: loop body
LE: loop exit
PB: predicated region body
PF: predicated region fallthrough
CT: control target
= control target key end

     0   :  { %s1771_s13 = smov 0   ;;  %s1773_s14 = smov 0   ;;  %s1961_s0 = inlined_call_operand.vmem [shape: s8[128,128], index: 0, kind: input, shape index: {}]   ;;  %s1962_s1 = inlined_call_operand.vmem [shape: f32[128,1], index: 1, kind: input, shape index: {}]   ;;  %s1963_s2 = inlined_call_operand.vmem [shape: bf16[128,128], index: 2, kind: input, shape index: {}, may-alias: {2,3}]   ;;  %s1964_s3 = inlined_call_operand.vmem [shape: bf16[128,128], index: 3, kind: input, shape index: {}, may-alias: {2,3}]   ;;  %s1965_s4 = inlined_call_operand.vmem [shape: bf16[256,128], index: 4, kind: input, shape index: {}]   ;;  %s1966_s5 = inlined_call_operand.vmem [shape: f32[1,128], index: 5, kind: input, shape index: {}]   ;;  %s1967_s6 = inlined_call_operand.vmem [shape: bf16[128,128], index: 6, kind: input, shape index: {}]   ;;  %s1968_s7 = inlined_call_operand.vmem [shape: f32[1,128], index: 7, kind: input, shape index: {}]   ;;  %s1969_s8 = inlined_call_operand.vmem [shape: bf16[128,128], index: 8, kind: input, shape index: {}]   ;;  %s1970_s9 = inlined_call_operand.vmem [shape: f32[1,128], index: 9, kind: input, shape index: {}]   ;;  %s1971_s10 = inlined_call_operand.vmem [shape: bf16[128,128], index: 10, kind: output, shape index: {}]  }
   0x1   :  { %s1775_s15 = smov 0  }
   0x2 LB: > { %s32_s16 = sadd.s32 1, %s1709_s14  ;;  %p1375_p0 = scmp.ge.s32.totalorder %s1713_s15, 1  ;;  %s1713_s15 = sphi %s1775_s15, %s20_s15   ;;  %s1709_s14 = sphi %s1773_s14, %s1973_s14   ;;  %s1705_s13 = sphi %s1771_s13, %s1972_s13  }
   0x3   : > { %p34_p1 = scmp.ge.s32.totalorder %s32_s16, 2  ;;  %p363_p2 = scmp.lt.s32.totalorder %s1713_s15, 3 }
   0x5   : > { %s1975_s16 = smov (%p34_p1, %s32_s16), 0  ;;  %p364_p3 = pnand %p1375_p0, %p363_p2 }
   0x6   : > { %s1376_s19 = sshll.u32 (!%p364_p3), %s1705_s13, 1  ;;  %s1378_s24 = sshll.u32 (!%p364_p3), %s1705_s13, 3 }
   0x7   : > { %367 = sbr.rel (%p364_p3) target bundleno = 889 (0x379), region = 60  ;;  %p420_p4 = scmp.lt.s32.totalorder (!%p364_p3), %s1376_s19, 3 }
   0x8   : > { %p429_p5 = scmp.lt.s32.totalorder (!%p364_p3), %s1378_s24, 15 }
   0xc   : > { %v1647_v0 = vld [vmem:[%s1963_s2 + $0x38] sm:$0xff]   ;;  %v1648_v1 = vld [vmem:[%s1963_s2 + $0x30] sm:$0xff]   ;;  %s1977_s19 = smov (!%p420_p4, %s1376_s19), 3  ;;  %v1715_v2 = vmov 0   ;;  %v1649_v3 = vld [vmem:[%s1963_s2 + $0x28] sm:$0xff]   ;;  %s1979_s24 = smov (!%p429_p5, %s1378_s24), 15 }
   0xd   : > { %1548 = vmatprep.subr.bf16.mxu0 %v1647_v0  ;;  %1645 = vset.pattern.permute.xlu0 %v1715_v2  ;;  %s1377_s25 = sshll.u32 %s1977_s19, 3  ;;  %v1650_v4 = vld [vmem:[%s1963_s2 + $0x20] sm:$0xff]   ;;  %v1655_v7 = vld [vmem:[%s1965_s4 + $0x78] sm:$0xff]   ;;  %s1379_s13 = sshll.u32 %s1979_s24, 3  ;;  %v1657_v9 = vld [vmem:[%s1965_s4 + $0x70] sm:$0xff]  }
   0xe   : > { %1549 = vmatpush3.bf16.msra.mxu0 %v1647_v0  ;;  %1646 = vset.pattern.permute.xlu1 %v1715_v2  ;;  %s1805_s28 = scalar_lea.vmem %s1961_s0, %s1377_s25  ;;  %v1656_v8 = vld [vmem:[%s1965_s4 + $0x38] sm:$0xff]   ;;  %s432_s21 = scalar_lea.vmem %s1962_s1, %s1379_s13  ;;  %v1652_v13 = vld [vmem:[%s1963_s2 + $0x10] sm:$0xff]   ;;  %v1659_v18 = vld [vmem:[%s1965_s4 + $0x68] sm:$0xff]  }
   0xf   : > { %1550 = vmatprep.subr.bf16.mxu0 %v1648_v1  ;;  %v465_v5 = vld [vmem:[%s1805_s28] sm:$0xff]  ;;  %v1651_v10 = vld [vmem:[%s1963_s2 + $0x18] sm:$0xff]   ;;  %v637_v12 = vld [vmem:[%s432_s21 + $0x10] sm:$0xff]  ;;  %1484 = vmatprep.subr.bf16.mxu1 %v1655_v7  ;;  %s1381_s30 = sshll.u32 %s1979_s24, 2 }
  0x10   : > { %v467_v6 = vunpack.c.l.s8.bf16 %v465_v5  ;;  %v635_v11 = vld [vmem:[%s432_s21] sm:$0xff]  ;;  %655 = vperm.xlu1 %1646, %v637_v12   ;;  %v636_v14 = vld [vmem:[%s432_s21 + $0x8] sm:$0xff]  ;;  %v638_v15 = vld [vmem:[%s432_s21 + $0x18] sm:$0xff]  ;;  %1485 = vmatpush3.bf16.msra.mxu1 %v1656_v8  ;;  %v468_v31 = vunpack.c.h.s8.bf16 %v465_v5  ;;  %s450_s27 = scalar_lea.vmem %s1971_s10, %s1381_s30 }
  0x11   : > { %645 = vperm.xlu0 %1645, %v635_v11   ;;  %1486 = vmatprep.subr.bf16.mxu1 %v1657_v9  ;;  %v1658_v16 = vld [vmem:[%s1965_s4 + $0x30] sm:$0xff]   ;;  %v639_v17 = vld [vmem:[%s432_s21 + $0x20] sm:$0xff]  ;;  %v640_v19 = vld [vmem:[%s432_s21 + $0x28] sm:$0xff] }
  0x12   : > { %1551 = vmatpush3.bf16.msra.mxu0 %v1648_v1  ;;  %1564 = vmatprep.mubr.bf16.mxu0 %v467_v6  ;;  %v1653_v20 = vld [vmem:[%s1963_s2 + $0x8] sm:$0xff]   ;;  %v1661_v22 = vld [vmem:[%s1965_s4 + $0x60] sm:$0xff]   ;;  %v641_v23 = vld [vmem:[%s432_s21 + $0x30] sm:$0xff] }
  0x13   : > { %1552 = vmatprep.subr.bf16.mxu0 %v1649_v3  ;;  %v1660_v21 = vld [vmem:[%s1965_s4 + $0x28] sm:$0xff]   ;;  %v642_v24 = vld [vmem:[%s432_s21 + $0x38] sm:$0xff]  ;;  %v1662_v25 = vld [vmem:[%s1965_s4 + $0x20] sm:$0xff]   ;;  %s1884_s21 = scalar_lea.vmem %s1964_s3, %s1381_s30 }
  0x14   : > { %660 = vperm.xlu1 %1646, %v638_v15   ;;  %1487 = vmatpush3.bf16.msra.mxu1 %v1658_v16  ;;  %v1654_v26 = vld [vmem:[%s1963_s2] sm:$0xff]   ;;  %v1663_v27 = vld [vmem:[%s1965_s4 + $0x58] sm:$0xff]   ;;  %v1665_v29 = vld [vmem:[%s1965_s4 + $0x50] sm:$0xff]  }
  0x15   : > { %650 = vperm.xlu0 %1645, %v636_v14   ;;  %1488 = vmatprep.subr.bf16.mxu1 %v1659_v18  ;;  %v1664_v28 = vld [vmem:[%s1965_s4 + $0x18] sm:$0xff]   ;;  %v466_v30 = vld [vmem:[%s1805_s28 + $0x8] sm:$0xff]  ;;  %v1666_v34 = vld [vmem:[%s1965_s4 + $0x10] sm:$0xff]  }
  0x16   : > { %1553 = vmatpush3.bf16.msra.mxu0 %v1649_v3  ;;  %v469_v32 = vunpack.c.l.s8.bf16 %v466_v30  ;;  %v470_v33 = vunpack.c.h.s8.bf16 %v466_v30  ;;  %v1667_v35 = vld [vmem:[%s1965_s4 + $0x48] sm:$0xff]   ;;  %v1669_v37 = vld [vmem:[%s1965_s4 + $0x40] sm:$0xff]   ;;  %v1675_v40 = vld [vmem:[%s1967_s6 + $0x38] sm:$0xff]  }
  0x17   : > { %1554 = vmatprep.subr.bf16.mxu0 %v1650_v4  ;;  %v1668_v36 = vld [vmem:[%s1965_s4 + $0x8] sm:$0xff]   ;;  %v1670_v38 = vld [vmem:[%s1965_s4] sm:$0xff]   ;;  %v1676_v41 = vld [vmem:[%s1967_s6 + $0x30] sm:$0xff]  }
  0x18   : > { %670 = vperm.xlu1 %1646, %v640_v19   ;;  %1489 = vmatpush3.bf16.msra.mxu1 %v1660_v21  ;;  %v1671_v39 = vld [vmem:[%s1884_s21] sm:$0xff]   ;;  %v1677_v42 = vld [vmem:[%s1967_s6 + $0x28] sm:$0xff]   ;;  %v1673_v60 = vld [vmem:[%s1884_s21 + $0x10] sm:$0xff]  }
  0x19   : > { %665 = vperm.xlu0 %1645, %v639_v17   ;;  %1490 = vmatprep.subr.bf16.mxu1 %v1661_v22  ;;  %v1672_v53 = vld [vmem:[%s1884_s21 + $0x8] sm:$0xff]   ;;  %v1674_v3 = vld [vmem:[%s1884_s21 + $0x18] sm:$0xff]   ;;  %v1680_v12 = vld [vmem:[%s1967_s6 + $0x10] sm:$0xff]  }
  0x1a   : > { %1555 = vmatpush3.bf16.msra.mxu0 %v1650_v4  ;;  %894 = vmatprep.mubr.bf16.mxu1 %v1671_v39  ;;  %v1679_v11 = vld [vmem:[%s1967_s6 + $0x18] sm:$0xff]   ;;  %v1682_v14 = vld [vmem:[%s1967_s6] sm:$0xff]   ;;  %v1684_v16 = vld [vmem:[%s1969_s8 + $0x30] sm:$0xff]  }
  0x1b   : > { %1556 = vmatprep.subr.bf16.mxu0 %v1651_v10  ;;  %v1683_v15 = vld [vmem:[%s1969_s8 + $0x38] sm:$0xff]   ;;  %v1685_v17 = vld [vmem:[%s1969_s8 + $0x28] sm:$0xff]   ;;  %v1686_v18 = vld [vmem:[%s1969_s8 + $0x20] sm:$0xff]  }
  0x1c   : > { %680 = vperm.xlu1 %1646, %v642_v24   ;;  %1491 = vmatpush3.bf16.msra.mxu1 %v1662_v25  ;;  %v1687_v19 = vld [vmem:[%s1969_s8 + $0x18] sm:$0xff]   ;;  %v1396_v24 = vld [vmem:[%s1966_s5] ss:$0 sm:$0xff] }
  0x1d   : > { %675 = vperm.xlu0 %1645, %v641_v23   ;;  %1492 = vmatprep.subr.bf16.mxu1 %v1663_v27 }
  0x1e   : > { %1557 = vmatpush3.bf16.msra.mxu0 %v1651_v10  ;;  %v1678_v10 = vld [vmem:[%s1967_s6 + $0x20] sm:$0xff]  }
  0x1f   : > { %1558 = vmatprep.subr.bf16.mxu0 %v1652_v13 }
  0x20   : > { %1493 = vmatpush3.bf16.msra.mxu1 %v1664_v28 }
  0x21   : > { %1494 = vmatprep.subr.bf16.mxu1 %v1665_v29 }
  0x22   : > { %1559 = vmatpush3.bf16.msra.mxu0 %v1652_v13  ;;  %v1681_v13 = vld [vmem:[%s1967_s6 + $0x8] sm:$0xff]  }
  0x23   : > { %1560 = vmatprep.subr.bf16.mxu0 %v1653_v20 }
  0x24   : > { %1495 = vmatpush3.bf16.msra.mxu1 %v1666_v34 }
  0x25   : > { %1496 = vmatprep.subr.bf16.mxu1 %v1667_v35 }
  0x26   : > { %1561 = vmatpush3.bf16.msra.mxu0 %v1653_v20 }
  0x27   : > { %1562 = vmatprep.subr.bf16.mxu0 %v1654_v26 }
  0x28   : > { %1497 = vmatpush3.bf16.msra.mxu1 %v1668_v36 }
  0x29   : > { %1498 = vmatprep.subr.bf16.mxu1 %v1669_v37 }
  0x2a   : > { %1563 = vmatpush3.bf16.msra.mxu0 %v1654_v26 }
  0x2b   : > { %1572 = vmatprep.subr.bf16.mxu0 %v1675_v40 }
  0x2c   : > { %1499 = vmatpush3.bf16.msra.mxu1 %v1670_v38 }
  0x2d   : > { %1565 = vmatmul.mubr.bf16.vlgmr.msra.gmra.mxu0 %v468_v31  ;;  %1596 = vmatprep.subr.bf16.mxu1 %v1683_v15 }
  0x2e   : > { %1568 = vmatprep.mubr.bf16.mxu0 %v469_v32  ;;  %1573 = vmatpush3.bf16.msra.mxu0 %v1675_v40 }
  0x2f   : > { %1574 = vmatprep.subr.bf16.mxu0 %v1676_v41 }
  0x32   : > { %1575 = vmatpush3.bf16.msra.mxu0 %v1676_v41 }
  0x33   : > { %1576 = vmatprep.subr.bf16.mxu0 %v1677_v42 }
  0x35   : > { %1569 = vmatmul.mubr.bf16.gmra.mxu0 %v470_v33 }
  0x36   : > { %1577 = vmatpush3.bf16.msra.mxu0 %v1677_v42 }
  0x37   : > { %1578 = vmatprep.subr.bf16.mxu0 %v1678_v10 }
  0x3a   : > { %1579 = vmatpush3.bf16.msra.mxu0 %v1678_v10 }
  0x3b   : > { %1580 = vmatprep.subr.bf16.mxu0 %v1679_v11 }
  0x3e   : > { %1581 = vmatpush3.bf16.msra.mxu0 %v1679_v11 }
  0x3f   : > { %1582 = vmatprep.subr.bf16.mxu0 %v1680_v12 }
  0x42   : > { %1583 = vmatpush3.bf16.msra.mxu0 %v1680_v12 }
  0x43   : > { %1584 = vmatprep.subr.bf16.mxu0 %v1681_v13 }
  0x46   : > { %1585 = vmatpush3.bf16.msra.mxu0 %v1681_v13 }
  0x47   : > { %1586 = vmatprep.subr.bf16.mxu0 %v1682_v14 }
  0x4a   : > { %1587 = vmatpush3.bf16.msra.mxu0 %v1682_v14 }
  0x8b   : > { %v656_v47 = vpop.permute.xlu1 %655 }
  0x8c   : > { %v646_v43 = vpop.permute.xlu0 %645 }
  0x8f   : > { %v661_v56 = vpop.permute.xlu1 %660 }
  0x90   : > { %v651_v48 = vpop.permute.xlu0 %650 }
  0x93   : > { %v671_v63 = vpop.permute.xlu1 %670 }
  0x94   : > { %v666_v1 = vpop.permute.xlu0 %665 }
  0x97   : > { %v681_v5 = vpop.permute.xlu1 %680 }
  0x98   : > { %v676_v7 = vpop.permute.xlu0 %675 }
  0xed   : > { %v1566_v44 = vpop.f32.mrf.mxu0 }
  0xee   : > { %v685_v59 = vmul.f32 %v1566_v44, %v656_v47 }
  0xef   : > { %v577_v45 = vpop.f32.mrf.mxu0 }
  0xf0   : > { %v683_v50 = vmul.f32 %v646_v43, %v577_v45 }
  0xf1   : > { %v1567_v46 = vpop.f32.mrf.mxu0 }
  0xf2   : > { %v686_v57 = vmul.f32 %v1567_v46, %v661_v56 }
  0xf3   : > { %v580_v49 = vpop.f32.mrf.mxu0 }
  0xf4   : > { %v684_v51 = vmul.f32 %v651_v48, %v580_v49  ;;  %v692_v61 = vpack.c.bf16 %v686_v57, %v685_v59  ;;  %v1688_v57 = vld [vmem:[%s1969_s8 + $0x10] sm:$0xff]   ;;  %v1690_v59 = vld [vmem:[%s1969_s8] sm:$0xff]  }
  0xf5   : > { %v1570_v52 = vpop.f32.mrf.mxu0 }
  0xf6   : > { %v691_v54 = vpack.c.bf16 %v684_v51, %v683_v50  ;;  %v689_v8 = vmul.f32 %v1570_v52, %v676_v7 }
  0xf7   : > { %v593_v55 = vpop.f32.mrf.mxu0 }
  0xf8   : > { %895 = vmatmul.mubr.bf16.vlgmr.msra.gmra.mxu1 %v691_v54  ;;  %v687_v2 = vmul.f32 %v666_v1, %v593_v55 }
  0xf9   : > { %902 = vmatprep.mubr.bf16.mxu1 %v1672_v53  ;;  %v1571_v58 = vpop.f32.mrf.mxu0  ;;  %1597 = vmatpush3.bf16.msra.mxu1 %v1683_v15 }
  0xfa   : > { %v690_v6 = vmul.f32 %v1571_v58, %v681_v5  ;;  %1598 = vmatprep.subr.bf16.mxu1 %v1684_v16  ;;  %v1689_v58 = vld [vmem:[%s1969_s8 + $0x8] sm:$0xff]  }
  0xfb   : > { %v596_v62 = vpop.f32.mrf.mxu0 }
  0xfc   : > { %v688_v0 = vmul.f32 %v671_v63, %v596_v62  ;;  %v694_v9 = vpack.c.bf16 %v690_v6, %v689_v8  ;;  %v1413_v62 = vld [vmem:[%s1968_s7] ss:$0 sm:$0xff] }
  0xfd   : > { %1599 = vmatpush3.bf16.msra.mxu1 %v1684_v16 }
  0xfe   : > { %v693_v4 = vpack.c.bf16 %v688_v0, %v687_v2  ;;  %1600 = vmatprep.subr.bf16.mxu1 %v1685_v17 }
 0x100   : > { %903 = vmatmul.mubr.bf16.gmra.mxu1 %v692_v61 }
 0x101   : > { %910 = vmatprep.mubr.bf16.mxu1 %v1673_v60  ;;  %1601 = vmatpush3.bf16.msra.mxu1 %v1685_v17 }
 0x102   : > { %1602 = vmatprep.subr.bf16.mxu1 %v1686_v18 }
 0x105   : > { %1603 = vmatpush3.bf16.msra.mxu1 %v1686_v18 }
 0x106   : > { %1604 = vmatprep.subr.bf16.mxu1 %v1687_v19 }
 0x108   : > { %911 = vmatmul.mubr.bf16.gmra.mxu1 %v693_v4 }
 0x109   : > { %918 = vmatprep.mubr.bf16.mxu1 %v1674_v3  ;;  %1605 = vmatpush3.bf16.msra.mxu1 %v1687_v19 }
 0x10a   : > { %1606 = vmatprep.subr.bf16.mxu1 %v1688_v57 }
 0x10d   : > { %1607 = vmatpush3.bf16.msra.mxu1 %v1688_v57 }
 0x10e   : > { %1608 = vmatprep.subr.bf16.mxu1 %v1689_v58 }
 0x110   : > { %919 = vmatmul.mubr.bf16.gmra.mxu1 %v694_v9 }
 0x111   : > { %1609 = vmatpush3.bf16.msra.mxu1 %v1689_v58 }
 0x112   : > { %1610 = vmatprep.subr.bf16.mxu1 %v1690_v59 }
 0x115   : > { %1611 = vmatpush3.bf16.msra.mxu1 %v1690_v59 }
 0x1b8   : > { %v1500_v20 = vpop.f32.mrf.mxu1 }
 0x1ba   : > { %v1501_v21 = vpop.f32.mrf.mxu1 }
 0x1bb   : > { %v1502_v23 = vadd.f32 %v1501_v21, %v1500_v20 }
 0x1bc   : > { %v1503_v22 = vpop.f32.mrf.mxu1 }
 0x1bd   : > { %v897_v28 = vadd.f32 %v1502_v23, %v1396_v24 }
 0x1be   : > { %v1504_v25 = vpop.f32.mrf.mxu1 }
 0x1bf   : > { %v1505_v26 = vadd.f32 %v1504_v25, %v1503_v22 }
 0x1c0   : > { %v1506_v27 = vpop.f32.mrf.mxu1 }
 0x1c1   : > { %v900_v29 = vadd.f32 %v1505_v26, %v1396_v24  ;;  %v1422_v26 = vld [vmem:[%s1970_s9] ss:$0 sm:$0xff] }
 0x1c2   : > { %v1507_v30 = vpop.f32.mrf.mxu1 }
 0x1c3   : > { %v927_v31 = vpack.c.bf16 %v900_v29, %v897_v28  ;;  %v1508_v33 = vadd.f32 %v1507_v30, %v1506_v27 }
 0x1c4   : > { %v1509_v32 = vpop.f32.mrf.mxu1 }
 0x1c5   : > { %1588 = vmatprep.mubr.bf16.mxu0 %v927_v31  ;;  %v905_v37 = vadd.f32 %v1508_v33, %v1396_v24 }
 0x1c6   : > { %v1510_v34 = vpop.f32.mrf.mxu1 }
 0x1c7   : > { %v1511_v35 = vadd.f32 %v1510_v34, %v1509_v32 }
 0x1c8   : > { %v1512_v36 = vpop.f32.mrf.mxu1 }
 0x1c9   : > { %v908_v38 = vadd.f32 %v1511_v35, %v1396_v24 }
 0x1ca   : > { %v1513_v39 = vpop.f32.mrf.mxu1 }
 0x1cb   : > { %v928_v40 = vpack.c.bf16 %v908_v38, %v905_v37  ;;  %v1514_v42 = vadd.f32 %v1513_v39, %v1512_v36 }
 0x1cc   : > { %v1515_v41 = vpop.f32.mrf.mxu1 }
 0x1cd   : > { %1589 = vmatmul.mubr.bf16.vlgmr.msra.gmra.mxu0 %v928_v40  ;;  %v913_v46 = vadd.f32 %v1514_v42, %v1396_v24 }
 0x1ce   : > { %v1516_v43 = vpop.f32.mrf.mxu1 }
 0x1cf   : > { %v1517_v44 = vadd.f32 %v1516_v43, %v1515_v41 }
 0x1d0   : > { %v1518_v45 = vpop.f32.mrf.mxu1 }
 0x1d1   : > { %v916_v47 = vadd.f32 %v1517_v44, %v1396_v24 }
 0x1d2   : > { %v1519_v48 = vpop.f32.mrf.mxu1 }
 0x1d3   : > { %v929_v49 = vpack.c.bf16 %v916_v47, %v913_v46  ;;  %v1520_v51 = vadd.f32 %v1519_v48, %v1518_v45 }
 0x1d4   : > { %v1521_v50 = vpop.f32.mrf.mxu1 }
 0x1d5   : > { %1592 = vmatprep.mubr.bf16.mxu0 %v929_v49  ;;  %v921_v54 = vadd.f32 %v1520_v51, %v1396_v24 }
 0x1d6   : > { %v1522_v52 = vpop.f32.mrf.mxu1 }
 0x1d7   : > { %v1523_v53 = vadd.f32 %v1522_v52, %v1521_v50 }
 0x1d9   : > { %v924_v55 = vadd.f32 %v1523_v53, %v1396_v24 }
 0x1db   : > { %v930_v56 = vpack.c.bf16 %v924_v55, %v921_v54 }
 0x1dd   : > { %1593 = vmatmul.mubr.bf16.gmra.mxu0 %v930_v56 }
 0x28d   : > { %v1590_v60 = vpop.f32.mrf.mxu0 }
 0x28e   : > { %v1045_v2 = vadd.f32 %v1590_v60, %v1413_v62 }
 0x28f   : > { %v1036_v61 = vpop.f32.mrf.mxu0 }
 0x290   : > { %v1037_v0 = vadd.f32 %v1413_v62, %v1036_v61  ;;  %v1069_v8 = vmax.f32 %v1045_v2, 0.0 }
 0x291   : > { %v1591_v63 = vpop.f32.mrf.mxu0 }
 0x292   : > { %v1048_v1 = vadd.f32 %v1591_v63, %v1413_v62  ;;  %v1067_v6 = vmax.f32 %v1037_v0, 0.0 }
 0x293   : > { %v1039_v3 = vpop.f32.mrf.mxu0 }
 0x294   : > { %v1040_v4 = vadd.f32 %v1413_v62, %v1039_v3  ;;  %v1070_v5 = vmax.f32 %v1048_v1, 0.0 }
 0x296   : > { %v1068_v7 = vmax.f32 %v1040_v4, 0.0  ;;  %v1076_v10 = vpack.c.bf16 %v1070_v5, %v1069_v8 }
 0x298   : > { %v1075_v9 = vpack.c.bf16 %v1068_v7, %v1067_v6 }
 0x29a   : > { %1612 = vmatprep.mubr.bf16.mxu1 %v1075_v9 }
 0x29b   : > { %1613 = vmatmul.mubr.bf16.vlgmr.msra.gmra.mxu1 %v1076_v10 }
 0x29d   : > { %v1594_v11 = vpop.f32.mrf.mxu0 }
 0x29e   : > { %v1061_v16 = vadd.f32 %v1594_v11, %v1413_v62 }
 0x29f   : > { %v1052_v12 = vpop.f32.mrf.mxu0 }
 0x2a0   : > { %v1053_v14 = vadd.f32 %v1413_v62, %v1052_v12  ;;  %v1073_v22 = vmax.f32 %v1061_v16, 0.0 }
 0x2a1   : > { %v1595_v13 = vpop.f32.mrf.mxu0 }
 0x2a2   : > { %v1064_v15 = vadd.f32 %v1595_v13, %v1413_v62  ;;  %v1071_v20 = vmax.f32 %v1053_v14, 0.0 }
 0x2a3   : > { %v1055_v17 = vpop.f32.mrf.mxu0 }
 0x2a4   : > { %v1056_v18 = vadd.f32 %v1413_v62, %v1055_v17  ;;  %v1074_v19 = vmax.f32 %v1064_v15, 0.0 }
 0x2a6   : > { %v1072_v21 = vmax.f32 %v1056_v18, 0.0  ;;  %v1078_v24 = vpack.c.bf16 %v1074_v19, %v1073_v22 }
 0x2a8   : > { %v1077_v23 = vpack.c.bf16 %v1072_v21, %v1071_v20 }
 0x2aa   : > { %1616 = vmatprep.mubr.bf16.mxu1 %v1077_v23 }
 0x2ab   : > { %1617 = vmatmul.mubr.bf16.gmra.mxu1 %v1078_v24 }
 0x35b   : > { %v1614_v25 = vpop.f32.mrf.mxu1 }
 0x35c   : > { %v1193_v28 = vadd.f32 %v1614_v25, %v1422_v26 }
 0x35d   : > { %v1184_v27 = vpop.f32.mrf.mxu1 }
 0x35e   : > { %v1185_v30 = vadd.f32 %v1422_v26, %v1184_v27  ;;  %v1217_v33 = vmax.f32 %v1193_v28, 0.0 }
 0x35f   : > { %v1615_v29 = vpop.f32.mrf.mxu1 }
 0x360   : > { %v1196_v31 = vadd.f32 %v1615_v29, %v1422_v26  ;;  %v1215_v36 = vmax.f32 %v1185_v30, 0.0 }
 0x361   : > { %v1187_v32 = vpop.f32.mrf.mxu1 }
 0x362   : > { %v1218_v34 = vmax.f32 %v1196_v31, 0.0  ;;  %v1188_v35 = vadd.f32 %v1422_v26, %v1187_v32 }
 0x364   : > { %v1457_v37 = vpack.c.bf16 %v1218_v34, %v1217_v33  ;;  %v1216_v38 = vmax.f32 %v1188_v35, 0.0 }
 0x366   : > { %1469 = vst [vmem:[%s450_s27 + $0x8] sm:$0xff] %v1457_v37   ;;  %v1452_v39 = vpack.c.bf16 %v1216_v38, %v1215_v36 }
 0x368   : > { %1453 = vst [vmem:[%s450_s27] sm:$0xff] %v1452_v39  }
 0x36b   : > { %v1618_v40 = vpop.f32.mrf.mxu1 }
 0x36c   : > { %v1209_v42 = vadd.f32 %v1618_v40, %v1422_v26 }
 0x36d   : > { %v1200_v41 = vpop.f32.mrf.mxu1 }
 0x36e   : > { %v1201_v44 = vadd.f32 %v1422_v26, %v1200_v41  ;;  %v1221_v47 = vmax.f32 %v1209_v42, 0.0 }
 0x36f   : > { %v1619_v43 = vpop.f32.mrf.mxu1 }
 0x370   : > { %v1212_v45 = vadd.f32 %v1619_v43, %v1422_v26  ;;  %v1219_v50 = vmax.f32 %v1201_v44, 0.0 }
 0x371   : > { %v1203_v46 = vpop.f32.mrf.mxu1 }
 0x372   : > { %v1222_v48 = vmax.f32 %v1212_v45, 0.0  ;;  %v1204_v49 = vadd.f32 %v1422_v26, %v1203_v46 }
 0x374   : > { %v1467_v51 = vpack.c.bf16 %v1222_v48, %v1221_v47  ;;  %v1220_v52 = vmax.f32 %v1204_v49, 0.0 }
 0x376   : > { %1471 = vst [vmem:[%s450_s27 + $0x18] sm:$0xff] %v1467_v51   ;;  %v1462_v53 = vpack.c.bf16 %v1220_v52, %v1219_v50 }
 0x378   : > { %1470 = vst [vmem:[%s450_s27 + $0x10] sm:$0xff] %v1462_v53  }
 0x379 PF: > { %s20_s15 = sadd.s32 1, %s1713_s15   ;;  %s1972_s13 = smov %s1709_s14 }
 0x37a   : > { %p17_p6 = scmp.ge.s32.totalorder %s20_s15, 4   ;;  %s1973_s14 = smov %s1975_s16 }
 0x37c   :  { %19 = sbr.rel (!%p17_p6) target bundleno = 2 (0x2), region = 107 }

</bundles_post_ra>
